<compile_context>
chip_gen: v5e
topology: v5e:2x2
jax: 0.10.0
libtpu: 0.0.40
codegen_flags: <defaults>
</compile_context>

<pallas_src>
import jax
import jax.numpy as jnp
from jax.experimental import pallas as pl
from jax.experimental.pallas import tpu as pltpu

H_IN = 28
K = 5
H_CONV = H_IN - K + 1            # 24
H_POOL = H_CONV // 2             # 12
C_OUT = 10
HALF = 128                       # one ow-parity half: 12*10 = 120 cols + 8 pad
CONV_LANES = 2 * HALF            # 256-lane conv accumulator (ow%2-major halves)
IM2COL_K = K * H_IN              # 140: contraction depth of the fused conv matmul
FC1_K = H_POOL * HALF            # 1536: fc1 contraction depth (padded flatten)
FLAT = C_OUT * H_POOL * H_POOL   # 1440 (torch flatten size, reference only)
HID = 50
N_CLASSES = 10

HID_PAD = 128                    # fc1 output padded to full lane width
CLS_PAD = 128                    # fc2 output padded to full lane width
NEG_LOGIT = -1e30                # bias for padded (fake) classes


def cnn_fused_kernel(xc_ref, wband_ref, bconv_ref, w1_ref, b1_ref,
                     w2_ref, b2_ref, o_ref):
    # xc_ref:    (bt*24, 140) bf16  im2col'd input rows, row = b*24 + oh
    # wband_ref: (140, 256)   bf16  banded conv weight, col = (ow%2)*128 + (ow//2)*10 + c
    # bconv_ref: (1, 256)     f32
    # w1_ref:    (1536, 128)  bf16  fc1 weight (rows permuted to our flatten order)
    # b1_ref:    (1, 128)     f32
    # w2_ref:    (128, 128)   bf16
    # b2_ref:    (1, 128)     f32   (-1e30 on the 118 padded class columns)
    # o_ref:     (bt, 128)    f32   lane-dense padded log-softmax
    bt = o_ref.shape[0]

    # ---- conv1 as ONE MXU matmul (bf16 in, f32 accumulate) + bias + ReLU.
    acc = jnp.dot(xc_ref[...], wband_ref[...],
                  preferred_element_type=jnp.float32)            # (bt*24, 256)
    acc = jnp.maximum(acc + bconv_ref[...], 0.0)
    # acc[b*24 + oh, (ow%2)*128 + (ow//2)*10 + c] == relu(conv)[b, c, oh, ow]

    # ---- 2x2 max pool, stride 2.
    # oh-pool over adjacent sublane row pairs ...
    a = acc.reshape(bt * H_POOL, 2, CONV_LANES)
    p = jnp.maximum(a[:, 0, :], a[:, 1, :])                      # (bt*12, 256)
    # ... ow-pool as a max of the two ALIGNED 128-lane halves (free select).
    m = jnp.maximum(p[:, :HALF], p[:, HALF:])                    # (bt*12, 128)

    # Single real relayout: fold the 12 pooled rows into lanes -> (bt, 1536).
    flat = m.reshape(bt, FC1_K).astype(jnp.bfloat16)

    # ---- fc1 -> ReLU -> fc2 -> log_softmax (lane-dense, padded to 128).
    h = jnp.dot(flat, w1_ref[...],
                preferred_element_type=jnp.float32) + b1_ref[...]
    h = jnp.maximum(h, 0.0)                                      # (bt, 128) f32
    logits = jnp.dot(h.astype(jnp.bfloat16), w2_ref[...],
                     preferred_element_type=jnp.float32) + b2_ref[...]
    # Padded classes sit at ~-1e30 -> exp underflows to 0, max unaffected.
    mx = jnp.max(logits, axis=1, keepdims=True)
    lse = mx + jnp.log(jnp.sum(jnp.exp(logits - mx), axis=1, keepdims=True))
    o_ref[...] = logits - lse                                    # full 128 lanes


def _prepare_params(params):
    """Convert PyTorch-layout parameters into the kernel's layouts."""
    w_conv, b_conv, w1, b1, w2, b2 = params

    # Banded conv weight: wband[i*28 + iw, (ow%2)*128 + (ow//2)*10 + c]
    #   = w_conv[c, 0, i, iw - ow]  for 0 <= iw - ow < K, else 0.
    w_t = jnp.transpose(w_conv[:, 0], (1, 2, 0))                 # (K, K, C_OUT) [i, j, c]
    iw = jnp.arange(H_IN)[:, None]                               # (28, 1)
    ow = jnp.arange(H_CONV)[None, :]                             # (1, 24)
    j = iw - ow                                                  # (28, 24)
    valid = (j >= 0) & (j < K)
    jc = jnp.clip(j, 0, K - 1)
    band = w_t[:, jc, :]                                         # (K, 28, 24, C_OUT)
    band = jnp.where(valid[None, :, :, None], band, 0.0)
    band = band.reshape(K, H_IN, H_POOL, 2, C_OUT)               # [i, iw, ow//2, ow%2, c]
    band = jnp.transpose(band, (0, 1, 3, 2, 4))                  # [i, iw, q, w, c]
    band = band.reshape(K, H_IN, 2, H_POOL * C_OUT)
    band = jnp.pad(band, ((0, 0), (0, 0), (0, 0), (0, HALF - H_POOL * C_OUT)))
    wband = band.reshape(IM2COL_K, CONV_LANES).astype(jnp.bfloat16)

    bc = jnp.pad(jnp.tile(b_conv, H_POOL), (0, HALF - H_POOL * C_OUT))
    bconv = jnp.tile(bc, 2)[None, :].astype(jnp.float32)         # (1, 256)

    # fc1: torch consumes a channel-major flatten (c*144 + oh*12 + ow); our
    # flatten index is oh*128 + ow*10 + c (8 zero lanes of pad per oh block),
    # so permute + zero-pad fc1's input rows accordingly.
    w1_t = w1.reshape(HID, C_OUT, H_POOL, H_POOL)                # [h, c, oh, ow]
    w1_t = jnp.transpose(w1_t, (2, 3, 1, 0))                     # [oh, ow, c, h]
    w1_t = w1_t.reshape(H_POOL, H_POOL * C_OUT, HID)
    w1_t = jnp.pad(w1_t, ((0, 0), (0, HALF - H_POOL * C_OUT), (0, HID_PAD - HID)))
    w1k = w1_t.reshape(FC1_K, HID_PAD).astype(jnp.bfloat16)      # (1536, 128)
    b1k = jnp.pad(b1, (0, HID_PAD - HID))[None, :].astype(jnp.float32)

    w2k = jnp.pad(w2.T, ((0, HID_PAD - HID),
                         (0, CLS_PAD - N_CLASSES))).astype(jnp.bfloat16)
    b2k = jnp.pad(b2, (0, CLS_PAD - N_CLASSES),
                  constant_values=NEG_LOGIT)[None, :].astype(jnp.float32)
    return wband, bconv, w1k, b1k, w2k, b2k


def _round_up(x, m):
    return (x + m - 1) // m * m


def cnn_forward(x_nchw, params, *, block_b=256):
    """Fused forward. x_nchw: (B, 1, 28, 28), params in PyTorch layout."""
    B = x_nchw.shape[0]

    # Batch tile: multiple of 8; prefer >= 2 grid steps so the "parallel"
    # grid axis can shard across TensorCores when the batch is big enough.
    b8 = _round_up(B, 8)
    bt = min(_round_up(block_b, 8), b8)
    if b8 > 8 and bt >= b8:
        bt = _round_up(b8 // 2, 8)
    b_pad = _round_up(B, bt)

    # im2col in the wrapper (bf16): xcol[b*24 + oh, i*28 + iw] = x[b, oh+i, iw].
    # Feeds conv1 as a single K=140 MXU matmul and keeps the kernel free of
    # misaligned sublane slices / lane concatenations.
    x = x_nchw.reshape(B, H_IN, H_IN).astype(jnp.bfloat16)
    xcol = jnp.concatenate([x[:, i:i + H_CONV, :] for i in range(K)], axis=-1)
    if b_pad != B:
        xcol = jnp.pad(xcol, ((0, b_pad - B), (0, 0), (0, 0)))
    xcol = xcol.reshape(b_pad * H_CONV, IM2COL_K)                # (b_pad*24, 140)

    wband, bconv, w1k, b1k, w2k, b2k = _prepare_params(params)

    out = pl.pallas_call(
        cnn_fused_kernel,
        out_shape=jax.ShapeDtypeStruct((b_pad, CLS_PAD), jnp.float32),
        grid=(b_pad // bt,),
        in_specs=[
            pl.BlockSpec((bt * H_CONV, IM2COL_K), lambda b: (b, 0)),
            # Weights/biases: constant index_map -> stay VMEM-resident.
            pl.BlockSpec((IM2COL_K, CONV_LANES), lambda b: (0, 0)),
            pl.BlockSpec((1, CONV_LANES), lambda b: (0, 0)),
            pl.BlockSpec((FC1_K, HID_PAD), lambda b: (0, 0)),
            pl.BlockSpec((1, HID_PAD), lambda b: (0, 0)),
            pl.BlockSpec((HID_PAD, CLS_PAD), lambda b: (0, 0)),
            pl.BlockSpec((1, CLS_PAD), lambda b: (0, 0)),
        ],
        out_specs=pl.BlockSpec((bt, CLS_PAD), lambda b: (b, 0)),
        compiler_params=pltpu.CompilerParams(
            dimension_semantics=("parallel",),
            vmem_limit_bytes=48 * 1024 * 1024,
        ),
    )(xcol, wband, bconv, w1k, b1k, w2k, b2k)
    return out[:B, :N_CLASSES]


def init_params(key):
    """Parameters in PyTorch layout: conv (O,I,Kh,Kw), linear (out,in)."""
    ks = jax.random.split(key, 6)
    w_conv = jax.random.normal(ks[0], (C_OUT, 1, K, K), jnp.float32) * 0.1
    b_conv = jax.random.normal(ks[1], (C_OUT,), jnp.float32) * 0.1
    w1 = jax.random.normal(ks[2], (HID, FLAT), jnp.float32) * 0.02
    b1 = jax.random.normal(ks[3], (HID,), jnp.float32) * 0.02
    w2 = jax.random.normal(ks[4], (N_CLASSES, HID), jnp.float32) * 0.1
    b2 = jax.random.normal(ks[5], (N_CLASSES,), jnp.float32) * 0.1
    return (w_conv, b_conv, w1, b1, w2, b2)


def reference_forward(x_nchw, params):
    """Pure-JAX f32 re-statement of the PyTorch module for correctness checks."""
    w_conv, b_conv, w1, b1, w2, b2 = params
    B = x_nchw.shape[0]
    x = x_nchw[:, 0]
    conv = jnp.zeros((B, C_OUT, H_CONV, H_CONV), jnp.float32) \
        + b_conv[None, :, None, None]
    for i in range(K):
        for j in range(K):
            conv = conv + x[:, None, i:i + H_CONV, j:j + H_CONV] \
                * w_conv[None, :, 0, i, j, None, None]
    conv = jnp.maximum(conv, 0.0)
    pooled = conv.reshape(B, C_OUT, H_POOL, 2, H_POOL, 2).max(axis=(3, 5))
    flat = pooled.reshape(B, FLAT)                 # channel-major == torch .view
    h = jnp.maximum(flat @ w1.T + b1, 0.0)
    logits = h @ w2.T + b2
    return jax.nn.log_softmax(logits, axis=1)


if __name__ == "__main__":
    key = jax.random.PRNGKey(0)
    pkey, xkey = jax.random.split(key)
    params = init_params(pkey)
    # fc1 in_features=1440 forces 28x28 single-channel inputs; use batch=2.
    x = jax.random.normal(xkey, (2, 1, H_IN, H_IN), jnp.float32)

    out = jax.block_until_ready(cnn_forward(x, params))
    ref = reference_forward(x, params)

    assert out.shape == (2, N_CLASSES)
    err = float(jnp.max(jnp.abs(out - ref)))
    # bf16 matmul operands with f32 accumulation: expected error ~1e-3.
    assert jnp.allclose(out, ref, atol=2e-2, rtol=2e-2), err
    print("KERNEL_OK")
</pallas_src>

<mosaic_0001>
module attributes {stable_mosaic.version = 11 : i64} {
  func.func @cnn_fused_kernel(%arg0: i32, %arg1: memref<192x140xbf16, #tpu.memory_space<vmem>>, %arg2: memref<140x256xbf16, #tpu.memory_space<vmem>>, %arg3: memref<1x256xf32, #tpu.memory_space<vmem>>, %arg4: memref<1536x128xbf16, #tpu.memory_space<vmem>>, %arg5: memref<1x128xf32, #tpu.memory_space<vmem>>, %arg6: memref<128x128xbf16, #tpu.memory_space<vmem>>, %arg7: memref<1x128xf32, #tpu.memory_space<vmem>>, %arg8: memref<8x128xf32, #tpu.memory_space<vmem>>) attributes {dimension_semantics = [#tpu.dimension_semantics<parallel>], iteration_bounds = array<i64: 1>, scalar_prefetch = 0 : i64, scratch_operands = 0 : i64, tpu.core_type = #tpu.core_type<tc>, window_params = [{transform_indices = @transform_0, window_bounds = array<i64: 192, 140>}, {pipeline_mode = #tpu.pipeline_mode<synchronous>, transform_indices = @transform_1, window_bounds = array<i64: 140, 256>}, {pipeline_mode = #tpu.pipeline_mode<synchronous>, transform_indices = @transform_2, window_bounds = array<i64: 1, 256>}, {pipeline_mode = #tpu.pipeline_mode<synchronous>, transform_indices = @transform_3, window_bounds = array<i64: 1536, 128>}, {pipeline_mode = #tpu.pipeline_mode<synchronous>, transform_indices = @transform_4, window_bounds = array<i64: 1, 128>}, {pipeline_mode = #tpu.pipeline_mode<synchronous>, transform_indices = @transform_5, window_bounds = array<i64: 128, 128>}, {pipeline_mode = #tpu.pipeline_mode<synchronous>, transform_indices = @transform_6, window_bounds = array<i64: 1, 128>}, {transform_indices = @transform_7, window_bounds = array<i64: 8, 128>}]} {
    %c0 = arith.constant 0 : index
    %c0_0 = arith.constant 0 : index
    %0 = vector.load %arg1[%c0, %c0_0] : memref<192x140xbf16, #tpu.memory_space<vmem>>, vector<192x140xbf16>
    %c0_1 = arith.constant 0 : index
    %c0_2 = arith.constant 0 : index
    %1 = vector.load %arg2[%c0_1, %c0_2] : memref<140x256xbf16, #tpu.memory_space<vmem>>, vector<140x256xbf16>
    %cst = arith.constant dense<0.000000e+00> : vector<192x256xf32>
    %2 = tpu.matmul %0, %1, %cst {dimension_numbers = #tpu.dot_dimension_numbers<[1], [0], [0], [1], [0, 0, 1, 1], [], []>} : vector<192x140xbf16>, vector<140x256xbf16>, vector<192x256xf32> -> vector<192x256xf32>
    %c0_3 = arith.constant 0 : index
    %c0_4 = arith.constant 0 : index
    %3 = vector.load %arg3[%c0_3, %c0_4] : memref<1x256xf32, #tpu.memory_space<vmem>>, vector<1x256xf32>
    %4 = vector.broadcast %3 : vector<1x256xf32> to vector<192x256xf32>
    %5 = arith.addf %2, %4 : vector<192x256xf32>
    %cst_5 = arith.constant 0.000000e+00 : f32
    %6 = vector.broadcast %cst_5 : f32 to vector<192x256xf32>
    %7 = arith.maximumf %5, %6 : vector<192x256xf32>
    %8 = vector.shape_cast %7 : vector<192x256xf32> to vector<96x2x256xf32>
    %9 = vector.extract_strided_slice %8 {offsets = [0, 0, 0], sizes = [96, 1, 256], strides = [1, 1, 1]} : vector<96x2x256xf32> to vector<96x1x256xf32>
    %10 = vector.shape_cast %9 : vector<96x1x256xf32> to vector<96x256xf32>
    %11 = vector.extract_strided_slice %8 {offsets = [0, 1, 0], sizes = [96, 1, 256], strides = [1, 1, 1]} : vector<96x2x256xf32> to vector<96x1x256xf32>
    %12 = vector.shape_cast %11 : vector<96x1x256xf32> to vector<96x256xf32>
    %13 = arith.maximumf %10, %12 : vector<96x256xf32>
    %14 = vector.extract_strided_slice %13 {offsets = [0, 0], sizes = [96, 128], strides = [1, 1]} : vector<96x256xf32> to vector<96x128xf32>
    %15 = vector.extract_strided_slice %13 {offsets = [0, 128], sizes = [96, 128], strides = [1, 1]} : vector<96x256xf32> to vector<96x128xf32>
    %16 = arith.maximumf %14, %15 : vector<96x128xf32>
    %17 = vector.shape_cast %16 : vector<96x128xf32> to vector<8x1536xf32>
    %18 = arith.truncf %17 : vector<8x1536xf32> to vector<8x1536xbf16>
    %c0_6 = arith.constant 0 : index
    %c0_7 = arith.constant 0 : index
    %19 = vector.load %arg4[%c0_6, %c0_7] : memref<1536x128xbf16, #tpu.memory_space<vmem>>, vector<1536x128xbf16>
    %cst_8 = arith.constant dense<0.000000e+00> : vector<8x128xf32>
    %20 = tpu.matmul %18, %19, %cst_8 {dimension_numbers = #tpu.dot_dimension_numbers<[1], [0], [0], [1], [0, 0, 1, 1], [], []>} : vector<8x1536xbf16>, vector<1536x128xbf16>, vector<8x128xf32> -> vector<8x128xf32>
    %c0_9 = arith.constant 0 : index
    %c0_10 = arith.constant 0 : index
    %21 = vector.load %arg5[%c0_9, %c0_10] : memref<1x128xf32, #tpu.memory_space<vmem>>, vector<1x128xf32>
    %22 = vector.broadcast %21 : vector<1x128xf32> to vector<8x128xf32>
    %23 = arith.addf %20, %22 : vector<8x128xf32>
    %cst_11 = arith.constant 0.000000e+00 : f32
    %24 = vector.broadcast %cst_11 : f32 to vector<8x128xf32>
    %25 = arith.maximumf %23, %24 : vector<8x128xf32>
    %26 = arith.truncf %25 : vector<8x128xf32> to vector<8x128xbf16>
    %c0_12 = arith.constant 0 : index
    %c0_13 = arith.constant 0 : index
    %27 = vector.load %arg6[%c0_12, %c0_13] : memref<128x128xbf16, #tpu.memory_space<vmem>>, vector<128x128xbf16>
    %cst_14 = arith.constant dense<0.000000e+00> : vector<8x128xf32>
    %28 = tpu.matmul %26, %27, %cst_14 {dimension_numbers = #tpu.dot_dimension_numbers<[1], [0], [0], [1], [0, 0, 1, 1], [], []>} : vector<8x128xbf16>, vector<128x128xbf16>, vector<8x128xf32> -> vector<8x128xf32>
    %c0_15 = arith.constant 0 : index
    %c0_16 = arith.constant 0 : index
    %29 = vector.load %arg7[%c0_15, %c0_16] : memref<1x128xf32, #tpu.memory_space<vmem>>, vector<1x128xf32>
    %30 = vector.broadcast %29 : vector<1x128xf32> to vector<8x128xf32>
    %31 = arith.addf %28, %30 : vector<8x128xf32>
    %cst_17 = arith.constant dense<0xFF800000> : vector<8xf32>
    %32 = vector.multi_reduction <maximumf>, %31, %cst_17 [1] : vector<8x128xf32> to vector<8xf32>
    %33 = vector.shape_cast %32 : vector<8xf32> to vector<8x1xf32>
    %34 = vector.broadcast %33 : vector<8x1xf32> to vector<8x128xf32>
    %35 = arith.subf %31, %34 : vector<8x128xf32>
    %36 = math.exp %35 : vector<8x128xf32>
    %cst_18 = arith.constant dense<0.000000e+00> : vector<8xf32>
    %37 = vector.multi_reduction <add>, %36, %cst_18 [1] : vector<8x128xf32> to vector<8xf32>
    %38 = vector.shape_cast %37 : vector<8xf32> to vector<8x1xf32>
    %39 = math.log %38 : vector<8x1xf32>
    %40 = arith.addf %33, %39 : vector<8x1xf32>
    %41 = vector.broadcast %40 : vector<8x1xf32> to vector<8x128xf32>
    %42 = arith.subf %31, %41 : vector<8x128xf32>
    %c0_19 = arith.constant 0 : index
    %c0_20 = arith.constant 0 : index
    %43 = vector.load %arg8[%c0_19, %c0_20] : memref<8x128xf32, #tpu.memory_space<vmem>>, vector<8x128xf32>
    tpu.vector_store %arg8[%c0_19, %c0_20], %42 {strides = array<i32>} : memref<8x128xf32, #tpu.memory_space<vmem>>, vector<8x128xf32>,
    return
  }
  func.func @transform_0(%arg0: i32) -> (i32, i32) {
    %c0_i32 = arith.constant 0 : i32
    %c0_i32_0 = arith.constant 0 : i32
    return %arg0, %c0_i32 : i32, i32
  }
  func.func @transform_1(%arg0: i32) -> (i32, i32) {
    %c0_i32 = arith.constant 0 : i32
    %c0_i32_0 = arith.constant 0 : i32
    %c0_i32_1 = arith.constant 0 : i32
    return %c0_i32, %c0_i32_0 : i32, i32
  }
  func.func @transform_2(%arg0: i32) -> (i32, i32) {
    %c0_i32 = arith.constant 0 : i32
    %c0_i32_0 = arith.constant 0 : i32
    %c0_i32_1 = arith.constant 0 : i32
    return %c0_i32, %c0_i32_0 : i32, i32
  }
  func.func @transform_3(%arg0: i32) -> (i32, i32) {
    %c0_i32 = arith.constant 0 : i32
    %c0_i32_0 = arith.constant 0 : i32
    %c0_i32_1 = arith.constant 0 : i32
    return %c0_i32, %c0_i32_0 : i32, i32
  }
  func.func @transform_4(%arg0: i32) -> (i32, i32) {
    %c0_i32 = arith.constant 0 : i32
    %c0_i32_0 = arith.constant 0 : i32
    %c0_i32_1 = arith.constant 0 : i32
    return %c0_i32, %c0_i32_0 : i32, i32
  }
  func.func @transform_5(%arg0: i32) -> (i32, i32) {
    %c0_i32 = arith.constant 0 : i32
    %c0_i32_0 = arith.constant 0 : i32
    %c0_i32_1 = arith.constant 0 : i32
    return %c0_i32, %c0_i32_0 : i32, i32
  }
  func.func @transform_6(%arg0: i32) -> (i32, i32) {
    %c0_i32 = arith.constant 0 : i32
    %c0_i32_0 = arith.constant 0 : i32
    %c0_i32_1 = arith.constant 0 : i32
    return %c0_i32, %c0_i32_0 : i32, i32
  }
  func.func @transform_7(%arg0: i32) -> (i32, i32) {
    %c0_i32 = arith.constant 0 : i32
    %c0_i32_0 = arith.constant 0 : i32
    return %arg0, %c0_i32 : i32, i32
  }
}

</mosaic_0001>

<bundles_post_ra>
// kernel: tpu_custom_call.1
= control target key start
LH: loop header
LB: loop body
LE: loop exit
PB: predicated region body
PF: predicated region fallthrough
CT: control target
= control target key end

     0   :  { %12 = vsyncpa [#allocation3], 0  ;;  %s5138_s0 = inlined_call_operand.vmem [shape: bf16[192,140], index: 0, kind: input, shape index: {}]   ;;  %s5139_s1 = inlined_call_operand.vmem [shape: bf16[140,256], index: 1, kind: input, shape index: {}]   ;;  %s5140_s2 = inlined_call_operand.vmem [shape: f32[1,256], index: 2, kind: input, shape index: {}]   ;;  %s5141_s3 = inlined_call_operand.hbm [shape: bf16[1536,128], index: 3, kind: input, shape index: {}]   ;;  %s5142_s4 = inlined_call_operand.vmem [shape: f32[1,128], index: 4, kind: input, shape index: {}]   ;;  %s5143_s5 = inlined_call_operand.vmem [shape: bf16[128,128], index: 5, kind: input, shape index: {}]   ;;  %s5144_s6 = inlined_call_operand.vmem [shape: f32[1,128], index: 6, kind: input, shape index: {}]   ;;  %s5145_s7 = inlined_call_operand.hbm [shape: f32[8,128], index: 7, kind: output, shape index: {}]  }
   0x1   :  { %13 = vsyncpa [#allocation4], 0  ;;  %s24_s26 = sshll.u32 %s5141_s3, 4  ;;  %s4199_s27 = smov [#allocation2]   ;;  %s25_s26 = int_to_ptr.hbm [resolvable:$true] %s24_s26 }
   0x2   :  { %s26_s28 = sshll.u32 %s4199_s27, 4  ;;  %s4200_s29 = smov 64   ;;  %s27_s28 = int_to_ptr.vmem [resolvable:$true] %s26_s28 }
   0x3   :  { %s4201_s30 = smov 4  }
   0x4   :  { %32 = dma.hbm_to_vmem [thread:$0]  %s25_s26, 12288, %s27_s28, [#allocation3], %s4200_s29, %s4200_s29, %s4201_s30  }
   0x5   :  { %4195 = dma.done.wait [#allocation3], 12288  }
   0x6   :  { %4196 = vsyncadd [#allocation3], 4294955008  ;;  %v3441_v0 = vld [vmem:[%s5139_s1 + $0x70] sm:$0xf]  ;;  %v4030_v1 = vld [vmem:[%s5139_s1 + $0x74] sm:$0xf0] }
   0x7   :  { %v4029_v2 = vld [vmem:[%s5139_s1 + $0x74] sm:$0xf]  ;;  %v3442_v3 = vor.u32 %v4030_v1, %v3441_v0  ;;  %v3443_v4 = vld [vmem:[%s5139_s1 + $0x78] sm:$0xf0]  ;;  %v3433_v5 = vld [vmem:[%s5139_s1 + $0x60] sm:$0xf] }
   0x8   :  { %v4028_v6 = vld [vmem:[%s5139_s1 + $0x64] sm:$0xf0]  ;;  %v3446_v7 = vor.u32 %v4029_v2, %v3443_v4  ;;  %v4027_v8 = vld [vmem:[%s5139_s1 + $0x64] sm:$0xf]  ;;  %v3435_v9 = vld [vmem:[%s5139_s1 + $0x68] sm:$0xf0] }
   0x9   :  { %332 = vmatpush.bf16.msra.mxu0 %v3442_v3  ;;  %v3434_v10 = vor.u32 %v4028_v6, %v3433_v5  ;;  %v3438_v11 = vor.u32 %v4027_v8, %v3435_v9  ;;  %v3425_v12 = vld [vmem:[%s5139_s1 + $0x50] sm:$0xf]  ;;  %v4026_v13 = vld [vmem:[%s5139_s1 + $0x54] sm:$0xf0]  ;;  %v4025_v14 = vld [vmem:[%s5139_s1 + $0x54] sm:$0xf] }
   0xa   :  { %470 = vmatpush.bf16.msra.mxu2 %v3446_v7  ;;  %v3427_v15 = vld [vmem:[%s5139_s1 + $0x58] sm:$0xf0]  ;;  %v3426_v16 = vor.u32 %v4026_v13, %v3425_v12  ;;  %v3417_v17 = vld [vmem:[%s5139_s1 + $0x40] sm:$0xf]  ;;  %vm325_vm0 = vcmask 1045504   ;;  %vm288_vm1 = vcmask 97280  }
   0xb   :  { %v3430_v18 = vor.u32 %v4025_v14, %v3427_v15  ;;  %v4024_v19 = vld [vmem:[%s5139_s1 + $0x44] sm:$0xf0]  ;;  %v4031_v20 = vld [vmem:[%s5139_s1 + $0x84] sm:$0xf]  ;;  %v3451_v21 = vld [vmem:[%s5139_s1 + $0x88] sm:$0x30] }
   0xc   :  { %v4023_v22 = vld [vmem:[%s5139_s1 + $0x44] sm:$0xf]  ;;  %v3419_v23 = vld [vmem:[%s5139_s1 + $0x48] sm:$0xf0]  ;;  %v3454_v24 = vor.u32 %v4031_v20, %v3451_v21  ;;  %v3418_v27 = vor.u32 %v4024_v19, %v3417_v17  ;;  %v3409_v28 = vld [vmem:[%s5139_s1 + $0x30] sm:$0xf] }
   0xd   :  { %333 = vmatpush.bf16.msra.mxu0 %v3434_v10  ;;  %v3991_v25 = vld [vmem:[%s5138_s0 + $0x4] sm:$0xf]  ;;  %v3291_v26 = vld [vmem:[%s5138_s0 + $0x8] sm:$0xf0]  ;;  %v3422_v31 = vor.u32 %v4023_v22, %v3419_v23  ;;  %v4022_v32 = vld [vmem:[%s5139_s1 + $0x34] sm:$0xf0] }
   0xe   :  { %471 = vmatpush.bf16.msra.mxu2 %v3438_v11  ;;  %v330_v29 = vsel %vm325_vm0, %v3454_v24, 0  ;;  %v3294_v30 = vor.u32 %v3991_v25, %v3291_v26  ;;  %v3449_v33 = vld [vmem:[%s5139_s1 + $0x80] sm:$0xf]  ;;  %v4032_v34 = vld [vmem:[%s5139_s1 + $0x84] sm:$0x30]  ;;  %v3410_v38 = vor.u32 %v4022_v32, %v3409_v28  ;;  %vm728_vm2 = vcmask 1041408  }
   0xf   :  { %546 = vmatpush.bf16.msra.mxu3 %v330_v29  ;;  %v4021_v35 = vld [vmem:[%s5139_s1 + $0x34] sm:$0xf]  ;;  %v3411_v36 = vld [vmem:[%s5139_s1 + $0x38] sm:$0xf0]  ;;  %v3450_v37 = vor.u32 %v4032_v34, %v3449_v33  ;;  %v3401_v41 = vld [vmem:[%s5139_s1 + $0x20] sm:$0xf] }
  0x10   :  { %v3414_v40 = vor.u32 %v4021_v35, %v3411_v36  ;;  %v4020_v42 = vld [vmem:[%s5139_s1 + $0x24] sm:$0xf0]  ;;  %v4019_v43 = vld [vmem:[%s5139_s1 + $0x24] sm:$0xf]  ;;  %v3403_v44 = vld [vmem:[%s5139_s1 + $0x28] sm:$0xf0] }
  0x11   :  { %334 = vmatpush.bf16.msra.mxu0 %v3426_v16  ;;  %v327_v39 = vsel %vm325_vm0, %v3450_v37, 0  ;;  %v3402_v45 = vor.u32 %v4020_v42, %v3401_v41  ;;  %v3406_v46 = vor.u32 %v4019_v43, %v3403_v44  ;;  %v3393_v47 = vld [vmem:[%s5139_s1 + $0x10] sm:$0xf]  ;;  %v4018_v48 = vld [vmem:[%s5139_s1 + $0x14] sm:$0xf0]  ;;  %vm730_vm3 = vcmask 1043458  }
  0x12   :  { %472 = vmatpush.bf16.msra.mxu2 %v3430_v18  ;;  %3467 = vmatmul.msk.bf16.vlgmr.msra.gmra.mxu3 %vm288_vm1, %v3294_v30  ;;  %v4017_v49 = vld [vmem:[%s5139_s1 + $0x14] sm:$0xf]  ;;  %v3395_v50 = vld [vmem:[%s5139_s1 + $0x18] sm:$0xf0]  ;;  %v3394_v51 = vor.u32 %v4018_v48, %v3393_v47  ;;  %v3385_v52 = vld [vmem:[%s5139_s1] sm:$0xf] }
  0x13   :  { %408 = vmatpush.bf16.msra.mxu1 %v327_v39  ;;  %v3398_v53 = vor.u32 %v4017_v49, %v3395_v50  ;;  %v4016_v54 = vld [vmem:[%s5139_s1 + $0x4] sm:$0xf0]  ;;  %v3993_v55 = vld [vmem:[%s5138_s0 + $0x14] sm:$0xf]  ;;  %v3299_v56 = vld [vmem:[%s5138_s0 + $0x18] sm:$0xf0] }
  0x14   :  { %v4015_v57 = vld [vmem:[%s5139_s1 + $0x4] sm:$0xf]  ;;  %v3387_v58 = vld [vmem:[%s5139_s1 + $0x8] sm:$0xf0]  ;;  %v3386_v59 = vor.u32 %v4016_v54, %v3385_v52  ;;  %v3289_v60 = vld [vmem:[%s5138_s0] sm:$0xf]  ;;  %v3302_v62 = vor.u32 %v3993_v55, %v3299_v56 }
  0x15   :  { %335 = vmatpush.bf16.msra.mxu0 %v3418_v27  ;;  %v3992_v61 = vld [vmem:[%s5138_s0 + $0x4] sm:$0xf0]  ;;  %v3390_v63 = vor.u32 %v4015_v57, %v3387_v58  ;;  %v3995_v1 = vld [vmem:[%s5138_s0 + $0x24] sm:$0xf]  ;;  %v3307_v2 = vld [vmem:[%s5138_s0 + $0x28] sm:$0xf0] }
  0x16   :  { %473 = vmatpush.bf16.msra.mxu2 %v3422_v31  ;;  %3455 = vmatmul.msk.bf16.vlgmr.msra.gmra.mxu1 %vm288_vm1, %v3294_v30  ;;  %v3290_v0 = vor.u32 %v3992_v61, %v3289_v60  ;;  %v3297_v3 = vld [vmem:[%s5138_s0 + $0x10] sm:$0xf]  ;;  %v3994_v4 = vld [vmem:[%s5138_s0 + $0x14] sm:$0xf0]  ;;  %v3310_v5 = vor.u32 %v3995_v1, %v3307_v2  ;;  %v3997_v7 = vld [vmem:[%s5138_s0 + $0x34] sm:$0xf] }
  0x17   :  { %v3298_v6 = vor.u32 %v3994_v4, %v3297_v3  ;;  %v3315_v8 = vld [vmem:[%s5138_s0 + $0x38] sm:$0xf0]  ;;  %v3305_v9 = vld [vmem:[%s5138_s0 + $0x20] sm:$0xf]  ;;  %v3996_v10 = vld [vmem:[%s5138_s0 + $0x24] sm:$0xf0] }
  0x18   :  { %v3318_v11 = vor.u32 %v3997_v7, %v3315_v8  ;;  %v3306_v12 = vor.u32 %v3996_v10, %v3305_v9  ;;  %v3999_v13 = vld [vmem:[%s5138_s0 + $0x44] sm:$0xf]  ;;  %v3323_v14 = vld [vmem:[%s5138_s0 + $0x48] sm:$0xf0]  ;;  %v3313_v15 = vld [vmem:[%s5138_s0 + $0x30] sm:$0xf] }
  0x19   :  { %336 = vmatpush.bf16.msra.mxu0 %v3410_v38  ;;  %v3998_v16 = vld [vmem:[%s5138_s0 + $0x34] sm:$0xf0]  ;;  %v3326_v17 = vor.u32 %v3999_v13, %v3323_v14  ;;  %v4001_v19 = vld [vmem:[%s5138_s0 + $0x54] sm:$0xf]  ;;  %v3331_v20 = vld [vmem:[%s5138_s0 + $0x58] sm:$0xf0] }
  0x1a   :  { %474 = vmatpush.bf16.msra.mxu2 %v3414_v40  ;;  %v3314_v18 = vor.u32 %v3998_v16, %v3313_v15  ;;  %v3321_v21 = vld [vmem:[%s5138_s0 + $0x40] sm:$0xf]  ;;  %v4000_v22 = vld [vmem:[%s5138_s0 + $0x44] sm:$0xf0]  ;;  %v3334_v23 = vor.u32 %v4001_v19, %v3331_v20  ;;  %v4003_v25 = vld [vmem:[%s5138_s0 + $0x64] sm:$0xf] }
  0x1b   :  { %v3322_v24 = vor.u32 %v4000_v22, %v3321_v21  ;;  %v3339_v26 = vld [vmem:[%s5138_s0 + $0x68] sm:$0xf0]  ;;  %v3329_v27 = vld [vmem:[%s5138_s0 + $0x50] sm:$0xf]  ;;  %v4002_v28 = vld [vmem:[%s5138_s0 + $0x54] sm:$0xf0] }
  0x1c   :  { %v3342_v29 = vor.u32 %v4003_v25, %v3339_v26  ;;  %v3330_v30 = vor.u32 %v4002_v28, %v3329_v27  ;;  %v4005_v31 = vld [vmem:[%s5138_s0 + $0x74] sm:$0xf]  ;;  %v3347_v32 = vld [vmem:[%s5138_s0 + $0x78] sm:$0xf0]  ;;  %v3337_v33 = vld [vmem:[%s5138_s0 + $0x60] sm:$0xf] }
  0x1d   :  { %337 = vmatpush.bf16.msra.mxu0 %v3402_v45  ;;  %v4004_v34 = vld [vmem:[%s5138_s0 + $0x64] sm:$0xf0]  ;;  %v3350_v35 = vor.u32 %v4005_v31, %v3347_v32  ;;  %v4007_v37 = vld [vmem:[%s5138_s0 + $0x84] sm:$0xf]  ;;  %v3355_v38 = vld [vmem:[%s5138_s0 + $0x88] sm:$0xf0] }
  0x1e   :  { %475 = vmatpush.bf16.msra.mxu2 %v3406_v46  ;;  %v3338_v36 = vor.u32 %v4004_v34, %v3337_v33  ;;  %v3345_v39 = vld [vmem:[%s5138_s0 + $0x70] sm:$0xf]  ;;  %v4006_v40 = vld [vmem:[%s5138_s0 + $0x74] sm:$0xf0]  ;;  %v3358_v41 = vor.u32 %v4007_v37, %v3355_v38  ;;  %v4009_v46 = vld [vmem:[%s5138_s0 + $0x94] sm:$0xf] }
  0x1f   :  { %v3346_v42 = vor.u32 %v4006_v40, %v3345_v39  ;;  %v3363_v47 = vld [vmem:[%s5138_s0 + $0x98] sm:$0xf0]  ;;  %v86_v48 = vld [vmem:[%s5140_s2] sm:$0x3]  ;;  %v4008_v50 = vld [vmem:[%s5138_s0 + $0x84] sm:$0xf0] }
  0x20   :  { %v3353_v49 = vld [vmem:[%s5138_s0 + $0x80] sm:$0xf]  ;;  %v4493_v52 = vperm.slane %v86_v48, 0  ;;  %v4048_v54 = vld [vmem:[#allocation2 + $0x78] sm:$0xff]  ;;  %v4497_v60 = vperm.slane %v86_v48, 1  ;;  %vm733_vm4 = vcmask 1045508  }
  0x21   :  { %338 = vmatpush.bf16.msra.mxu0 %v3394_v51  ;;  %v3366_v51 = vor.u32 %v4009_v46, %v3363_v47  ;;  %3032 = vmatpush.bf16.msrb.mxu3 %v4048_v54  ;;  %v3371_v1 = vld [vmem:[%s5138_s0 + $0xa8] sm:$0xf0]  ;;  %v4040_v2 = vld [vmem:[#allocation2 + $0x38] sm:$0xff]  ;;  %v3361_v9 = vld [vmem:[%s5138_s0 + $0x90] sm:$0xf]  ;;  %vm1955_vm5 = vcmask 1041409  }
  0x22   :  { %476 = vmatpush.bf16.msra.mxu2 %v3398_v53  ;;  %3468 = vmatmul.msk.bf16.gmra.mxu3 %vm288_vm1, %v3302_v62  ;;  %v3354_v53 = vor.u32 %v4008_v50, %v3353_v49  ;;  %v4064_v3 = vld [vmem:[#allocation2 + $0xf8] sm:$0xff]  ;;  %vm1957_vm6 = vcmask 1042434   ;;  %v3369_v40 = vld [vmem:[%s5138_s0 + $0xa0] sm:$0xf]  ;;  %vm1959_vm7 = vcmask 1043459   ;;  %vm1961_vm8 = vcmask 1044484  }
  0x23   :  { %v4056_v4 = vld [vmem:[#allocation2 + $0xb8] sm:$0xff]  ;;  %3019 = vmatpush.bf16.msrb.mxu1 %v4040_v2  ;;  %vm1963_vm9 = vcmask 1045509   ;;  %vm1965_vm10 = vcmask 1046534   ;;  %vm1967_vm11 = vcmask 1047559   ;;  %vm2058_vm12 = vcmask 1040384   ;;  %s4202_s19 = smov [#allocation5]  }
  0x24   :  { %v4010_v10 = vld [vmem:[%s5138_s0 + $0x94] sm:$0xf0]  ;;  %s3275_s20 = sshll.u32 %s4202_s19, 4  ;;  %s3276_s20 = int_to_ptr.vmem [resolvable:$true] %s3275_s20 }
  0x25   :  { %339 = vmatpush.bf16.msra.mxu0 %v3386_v59  ;;  %v3362_v16 = vor.u32 %v4010_v10, %v3361_v9 }
  0x26   :  { %477 = vmatpush.bf16.msra.mxu2 %v3390_v63  ;;  %3456 = vmatmul.msk.bf16.gmra.mxu1 %vm288_vm1, %v3302_v62 }
  0x28   :  { %340 = vmatmul.bf16.vlgmr.msra.gmra.mxu0 %v3290_v0 }
  0x29   :  { %478 = vmatmul.bf16.vlgmr.msra.gmra.mxu2 %v3290_v0  ;;  %v4011_v0 = vld [vmem:[%s5138_s0 + $0xa4] sm:$0xf]  ;;  %3045 = vmatpush.bf16.msrb.mxu0 %v4056_v4 }
  0x2a   :  { %3058 = vmatpush.bf16.msrb.mxu2 %v4064_v3 }
  0x32   :  { %3469 = vmatmul.msk.bf16.gmra.mxu3 %vm288_vm1, %v3310_v5 }
  0x36   :  { %3457 = vmatmul.msk.bf16.gmra.mxu1 %vm288_vm1, %v3310_v5 }
  0x38   :  { %345 = vmatmul.bf16.gmra.mxu0 %v3298_v6 }
  0x39   :  { %483 = vmatmul.bf16.gmra.mxu2 %v3298_v6 }
  0x42   :  { %3470 = vmatmul.msk.bf16.gmra.mxu3 %vm288_vm1, %v3318_v11 }
  0x46   :  { %3458 = vmatmul.msk.bf16.gmra.mxu1 %vm288_vm1, %v3318_v11  ;;  %v3374_v11 = vor.u32 %v4011_v0, %v3371_v1 }
  0x48   :  { %350 = vmatmul.bf16.gmra.mxu0 %v3306_v12 }
  0x49   :  { %488 = vmatmul.bf16.gmra.mxu2 %v3306_v12 }
  0x52   :  { %3471 = vmatmul.msk.bf16.gmra.mxu3 %vm288_vm1, %v3326_v17 }
  0x56   :  { %3459 = vmatmul.msk.bf16.gmra.mxu1 %vm288_vm1, %v3326_v17 }
  0x58   :  { %355 = vmatmul.bf16.gmra.mxu0 %v3314_v18 }
  0x59   :  { %493 = vmatmul.bf16.gmra.mxu2 %v3314_v18 }
  0x62   :  { %3472 = vmatmul.msk.bf16.gmra.mxu3 %vm288_vm1, %v3334_v23 }
  0x66   :  { %3460 = vmatmul.msk.bf16.gmra.mxu1 %vm288_vm1, %v3334_v23 }
  0x68   :  { %360 = vmatmul.bf16.gmra.mxu0 %v3322_v24 }
  0x69   :  { %498 = vmatmul.bf16.gmra.mxu2 %v3322_v24 }
  0x72   :  { %3473 = vmatmul.msk.bf16.gmra.mxu3 %vm288_vm1, %v3342_v29 }
  0x76   :  { %3461 = vmatmul.msk.bf16.gmra.mxu1 %vm288_vm1, %v3342_v29 }
  0x78   :  { %365 = vmatmul.bf16.gmra.mxu0 %v3330_v30 }
  0x79   :  { %503 = vmatmul.bf16.gmra.mxu2 %v3330_v30 }
  0x82   :  { %3474 = vmatmul.msk.bf16.gmra.mxu3 %vm288_vm1, %v3350_v35 }
  0x86   :  { %3462 = vmatmul.msk.bf16.gmra.mxu1 %vm288_vm1, %v3350_v35 }
  0x88   :  { %370 = vmatmul.bf16.gmra.mxu0 %v3338_v36 }
  0x89   :  { %508 = vmatmul.bf16.gmra.mxu2 %v3338_v36 }
  0x92   :  { %3475 = vmatmul.msk.bf16.gmra.mxu3 %vm288_vm1, %v3358_v41 }
  0x93   :  { %v410_v43 = vpop.f32.mrf.mxu1 }
  0x95   :  { %v548_v44 = vpop.f32.mrf.mxu3 }
  0x96   :  { %3463 = vmatmul.msk.bf16.gmra.mxu1 %vm288_vm1, %v3358_v41  ;;  %v4012_v41 = vld [vmem:[%s5138_s0 + $0xa4] sm:$0xf0] }
  0x98   :  { %375 = vmatmul.bf16.gmra.mxu0 %v3346_v42 }
  0x99   :  { %513 = vmatmul.bf16.gmra.mxu2 %v3346_v42 }
  0x9b   :  { %v4476_v45 = vpop.f32.mrf.mxu1 }
  0x9d   :  { %v550_v56 = vpop.f32.mrf.mxu3 }
  0xa2   :  { %3476 = vmatmul.msk.bf16.gmra.mxu3 %vm288_vm1, %v3366_v51 }
  0xa3   :  { %v415_v59 = vpop.f32.mrf.mxu1 }
  0xa5   :  { %v341_v55 = vpop.f32.mrf.mxu0  ;;  %v4507_v6 = vpop.f32.mrf.mxu3 }
  0xa6   :  { %v342_v57 = vadd.f32 %v341_v55, %v4493_v52  ;;  %3464 = vmatmul.msk.bf16.gmra.mxu1 %vm288_vm1, %v3366_v51 }
  0xa8   :  { %v411_v58 = vadd.f32 %v410_v43, %v342_v57  ;;  %380 = vmatmul.bf16.gmra.mxu0 %v3354_v53  ;;  %v4013_v43 = vld [vmem:[%s5138_s0 + $0xb4] sm:$0xf] }
  0xa9   :  { %518 = vmatmul.bf16.gmra.mxu2 %v3354_v53 }
  0xaa   :  { %v608_v7 = vmax.f32 %v411_v58, 0.0 }
  0xab   :  { %v4515_v12 = vpop.f32.mrf.mxu1 }
  0xac   :  { %v479_v61 = vpop.f32.mrf.mxu2 }
  0xad   :  { %v480_v62 = vadd.f32 %v479_v61, %v4497_v60  ;;  %v343_v63 = vpop.f32.mrf.mxu0  ;;  %v4526_v35 = vpop.f32.mrf.mxu3 }
  0xae   :  { %v344_v14 = vadd.f32 %v343_v63, %v4493_v52 }
  0xaf   :  { %v549_v5 = vadd.f32 %v548_v44, %v480_v62  ;;  %v3379_v44 = vld [vmem:[%s5138_s0 + $0xb8] sm:$0xf0] }
  0xb0   :  { %v413_v32 = vadd.f32 %v4476_v45, %v344_v14  ;;  %v3382_v61 = vor.u32 %v4013_v43, %v3379_v44 }
  0xb1   :  { %v609_v8 = vmax.f32 %v549_v5, 0.0 }
  0xb2   :  { %3477 = vmatmul.msk.bf16.gmra.mxu3 %vm288_vm1, %v3374_v11  ;;  %v610_v51 = vmax.f32 %v413_v32, 0.0 }
  0xb3   :  { %v704_v13 = vrot.slane %v609_v8, 6  ;;  %v4541_v50 = vpop.f32.mrf.mxu1 }
  0xb4   :  { %v481_v15 = vpop.f32.mrf.mxu2 }
  0xb5   :  { %v729_v17 = vsel %vm728_vm2, %v608_v7, %v704_v13  ;;  %v731_v18 = vsel %vm730_vm3, %v608_v7, %v704_v13  ;;  %v734_v19 = vsel %vm733_vm4, %v608_v7, %v704_v13  ;;  %v736_v20 = vsel %vm325_vm0, %v704_v13, %v608_v7  ;;  %v346_v21 = vpop.f32.mrf.mxu0  ;;  %v4047_v7 = vld [vmem:[#allocation2 + $0x70] sm:$0xff] }
  0xb6   :  { %v732_v22 = vrot.slane %v731_v18, 2  ;;  %v735_v23 = vrot.slane %v734_v19, 4  ;;  %v737_v24 = vrot.slane %v736_v20, 6  ;;  %v3479_v25 = vrot.slane %v729_v17, 9  ;;  %3465 = vmatmul.msk.bf16.gmra.mxu1 %vm288_vm1, %v3374_v11  ;;  %3033 = vmatpush.bf16.msrb.mxu3 %v4047_v7 }
  0xb7   :  { %v482_v26 = vadd.f32 %v481_v15, %v4497_v60  ;;  %v347_v27 = vadd.f32 %v346_v21, %v4493_v52  ;;  %v4552_v21 = vpop.f32.mrf.mxu3 }
  0xb8   :  { %v3480_v28 = vrot.slane %v732_v22, 9  ;;  %v3481_v29 = vrot.slane %v735_v23, 9  ;;  %v3482_v30 = vrot.slane %v737_v24, 9  ;;  %v1283_v31 = vmax.f32 %v729_v17, %v3479_v25  ;;  %385 = vmatmul.bf16.gmra.mxu0 %v3362_v16 }
  0xb9   :  { %v551_v33 = vadd.f32 %v550_v56, %v482_v26  ;;  %v416_v34 = vadd.f32 %v415_v59, %v347_v27  ;;  %523 = vmatmul.bf16.gmra.mxu2 %v3362_v16  ;;  %v3370_v56 = vor.u32 %v4012_v41, %v3369_v40 }
  0xba   :  { %v1284_v36 = vmax.f32 %v732_v22, %v3480_v28  ;;  %v1285_v37 = vmax.f32 %v735_v23, %v3481_v29  ;;  %v1286_v38 = vmax.f32 %v737_v24, %v3482_v30  ;;  %v1475_v39 = vrot.slane %v1283_v31, 2 }
  0xbb   :  { %v611_v42 = vmax.f32 %v551_v33, 0.0 }
  0xbc   :  { %v1476_v45 = vrot.slane %v1284_v36, 2  ;;  %v1477_v46 = vrot.slane %v1285_v37, 2  ;;  %v1478_v47 = vrot.slane %v1286_v38, 2  ;;  %v1667_v48 = vmax.f32 %v1283_v31, %v1475_v39  ;;  %v484_v49 = vpop.f32.mrf.mxu2 }
  0xbd   :  { %v705_v53 = vrot.slane %v611_v42, 6  ;;  %v485_v54 = vadd.f32 %v484_v49, %v4497_v60  ;;  %v348_v55 = vpop.f32.mrf.mxu0 }
  0xbe   :  { %v1668_v57 = vmax.f32 %v1284_v36, %v1476_v45  ;;  %v1669_v58 = vmax.f32 %v1285_v37, %v1477_v46  ;;  %v1670_v59 = vmax.f32 %v1286_v38, %v1478_v47  ;;  %v1859_v2 = vperm.slane %v1667_v48, 0  ;;  %v4559_v37 = vpop.f32.mrf.mxu1 }
  0xbf   :  { %v738_v62 = vsel %vm728_vm2, %v610_v51, %v705_v53  ;;  %v739_v63 = vsel %vm730_vm3, %v610_v51, %v705_v53  ;;  %v741_v0 = vsel %vm733_vm4, %v610_v51, %v705_v53  ;;  %v743_v1 = vsel %vm325_vm0, %v705_v53, %v610_v51 }
  0xc0   :  { %v1860_v3 = vperm.slane %v1668_v57, 0  ;;  %v1861_v4 = vperm.slane %v1669_v58, 0  ;;  %v740_v5 = vrot.slane %v739_v63, 2  ;;  %v742_v8 = vrot.slane %v741_v0, 4  ;;  %v4039_v58 = vld [vmem:[#allocation2 + $0x30] sm:$0xff] }
  0xc1   :  { %v744_v9 = vrot.slane %v743_v1, 6  ;;  %v3483_v10 = vrot.slane %v738_v62, 9  ;;  %v554_v11 = vadd.f32 %v4507_v6, %v485_v54  ;;  %v1862_v13 = vperm.slane %v1670_v59, 0  ;;  %v4063_v59 = vld [vmem:[#allocation2 + $0xf0] sm:$0xff]  ;;  %3020 = vmatpush.bf16.msrb.mxu1 %v4039_v58 }
  0xc2   :  { %v1956_v14 = vsel %vm1955_vm5, %v1860_v3, %v1859_v2  ;;  %v3484_v15 = vrot.slane %v740_v5, 9  ;;  %v349_v16 = vadd.f32 %v348_v55, %v4493_v52  ;;  %v3485_v18 = vrot.slane %v742_v8, 9  ;;  %3478 = vmatmul.msk.bf16.gmra.mxu3 %vm288_vm1, %v3382_v61  ;;  %3059 = vmatpush.bf16.msrb.mxu2 %v4063_v59 }
  0xc3   :  { %v1958_v17 = vsel %vm1957_vm6, %v1861_v4, %v1956_v14  ;;  %v3486_v19 = vrot.slane %v744_v9, 9  ;;  %v1287_v20 = vmax.f32 %v738_v62, %v3483_v10  ;;  %v612_v6 = vmax.f32 %v416_v34, 0.0  ;;  %v4055_v62 = vld [vmem:[#allocation2 + $0xb0] sm:$0xff] }
  0xc4   :  { %v1960_v22 = vsel %vm1959_vm7, %v1862_v13, %v1958_v17  ;;  %v1288_v23 = vmax.f32 %v740_v5, %v3484_v15  ;;  %v613_v24 = vmax.f32 %v554_v11, 0.0  ;;  %v486_v25 = vpop.f32.mrf.mxu2  ;;  %v1289_v26 = vmax.f32 %v742_v8, %v3485_v18  ;;  %v4571_v8 = vpop.f32.mrf.mxu3  ;;  %3046 = vmatpush.bf16.msrb.mxu0 %v4055_v62 }
  0xc5   :  { %v1290_v27 = vmax.f32 %v744_v9, %v3486_v19  ;;  %v1479_v28 = vrot.slane %v1287_v20, 2  ;;  %v487_v29 = vadd.f32 %v486_v25, %v4497_v60  ;;  %v351_v30 = vpop.f32.mrf.mxu0  ;;  %v418_v33 = vadd.f32 %v4515_v12, %v349_v16 }
  0xc6   :  { %v1480_v31 = vrot.slane %v1288_v23, 2  ;;  %v706_v32 = vrot.slane %v613_v24, 6  ;;  %v352_v36 = vadd.f32 %v351_v30, %v4493_v52  ;;  %v1481_v38 = vrot.slane %v1289_v26, 2  ;;  %3466 = vmatmul.msk.bf16.gmra.mxu1 %vm288_vm1, %v3382_v61 }
  0xc7   :  { %v1482_v34 = vrot.slane %v1290_v27, 2  ;;  %v1671_v39 = vmax.f32 %v1287_v20, %v1479_v28  ;;  %v556_v40 = vadd.f32 %v4526_v35, %v487_v29  ;;  %v614_v13 = vmax.f32 %v418_v33, 0.0 }
  0xc8   :  { %v1672_v41 = vmax.f32 %v1288_v23, %v1480_v31  ;;  %v745_v42 = vsel %vm728_vm2, %v612_v6, %v706_v32  ;;  %v746_v43 = vsel %vm730_vm3, %v612_v6, %v706_v32  ;;  %v748_v44 = vsel %vm733_vm4, %v612_v6, %v706_v32  ;;  %390 = vmatmul.bf16.gmra.mxu0 %v3370_v56 }
  0xc9   :  { %v1673_v45 = vmax.f32 %v1289_v26, %v1481_v38  ;;  %v1674_v46 = vmax.f32 %v1290_v27, %v1482_v34  ;;  %v1863_v12 = vperm.slane %v1671_v39, 0  ;;  %v747_v47 = vrot.slane %v746_v43, 2  ;;  %528 = vmatmul.bf16.gmra.mxu2 %v3370_v56 }
  0xca   :  { %v1864_v48 = vperm.slane %v1672_v41, 0  ;;  %v749_v49 = vrot.slane %v748_v44, 4  ;;  %v750_v51 = vsel %vm325_vm0, %v706_v32, %v612_v6  ;;  %v3487_v35 = vrot.slane %v745_v42, 9 }
  0xcb   :  { %v1865_v53 = vperm.slane %v1673_v45, 0  ;;  %v1866_v54 = vperm.slane %v1674_v46, 0  ;;  %v1962_v55 = vsel %vm1961_vm8, %v1863_v12, %v1960_v22  ;;  %v751_v57 = vrot.slane %v750_v51, 6  ;;  %v4578_v22 = vpop.f32.mrf.mxu1 }
  0xcc   :  { %v1964_v63 = vsel %vm1963_vm9, %v1864_v48, %v1962_v55  ;;  %v3488_v0 = vrot.slane %v747_v47, 9  ;;  %v3489_v1 = vrot.slane %v749_v49, 9  ;;  %v1291_v56 = vmax.f32 %v745_v42, %v3487_v35  ;;  %v489_v2 = vpop.f32.mrf.mxu2  ;;  %v3377_v55 = vld [vmem:[%s5138_s0 + $0xb0] sm:$0xf] }
  0xcd   :  { %v1966_v61 = vsel %vm1965_vm10, %v1865_v53, %v1964_v63  ;;  %v3490_v3 = vrot.slane %v751_v57, 9  ;;  %v615_v4 = vmax.f32 %v556_v40, 0.0  ;;  %v421_v5 = vadd.f32 %v4541_v50, %v352_v36  ;;  %v353_v7 = vpop.f32.mrf.mxu0 }
  0xce   :  { %v1292_v9 = vmax.f32 %v747_v47, %v3488_v0  ;;  %v1293_v10 = vmax.f32 %v749_v49, %v3489_v1  ;;  %v1483_v11 = vrot.slane %v1291_v56, 2  ;;  %v4574_v14 = vsel %vm1967_vm11, %v1866_v54, %v1966_v61  ;;  %v563_v54 = vpop.f32.mrf.mxu3 }
  0xcf   :  { %v1294_v15 = vmax.f32 %v751_v57, %v3490_v3  ;;  %v707_v16 = vrot.slane %v615_v4, 6  ;;  %v490_v17 = vadd.f32 %v489_v2, %v4497_v60  ;;  %v354_v20 = vadd.f32 %v353_v7, %v4493_v52 }
  0xd0   :  { %v1484_v18 = vrot.slane %v1292_v9, 2  ;;  %v1485_v19 = vrot.slane %v1293_v10, 2  ;;  %v1675_v50 = vmax.f32 %v1291_v56, %v1483_v11  ;;  %v616_v43 = vmax.f32 %v421_v5, 0.0 }
  0xd1   :  { %v1486_v23 = vrot.slane %v1294_v15, 2  ;;  %v752_v6 = vsel %vm728_vm2, %v614_v13, %v707_v16  ;;  %v753_v24 = vsel %vm730_vm3, %v614_v13, %v707_v16  ;;  %v755_v25 = vsel %vm733_vm4, %v614_v13, %v707_v16 }
  0xd2   :  { %v1676_v26 = vmax.f32 %v1292_v9, %v1484_v18  ;;  %v1677_v27 = vmax.f32 %v1293_v10, %v1485_v19  ;;  %v1867_v28 = vperm.slane %v1675_v50, 0  ;;  %v754_v29 = vrot.slane %v753_v24, 2 }
  0xd3   :  { %v1678_v30 = vmax.f32 %v1294_v15, %v1486_v23  ;;  %v756_v31 = vrot.slane %v755_v25, 4  ;;  %v757_v32 = vsel %vm325_vm0, %v707_v16, %v614_v13  ;;  %v3491_v33 = vrot.slane %v752_v6, 9  ;;  %v427_v5 = vpop.f32.mrf.mxu1 }
  0xd4   :  { %v1868_v36 = vperm.slane %v1676_v26, 0  ;;  %v1869_v38 = vperm.slane %v1677_v27, 0  ;;  %v758_v34 = vrot.slane %v757_v32, 6  ;;  %v3492_v39 = vrot.slane %v754_v29, 9  ;;  %v491_v40 = vpop.f32.mrf.mxu2 }
  0xd5   :  { %v3493_v41 = vrot.slane %v756_v31, 9  ;;  %v1295_v42 = vmax.f32 %v752_v6, %v3491_v33  ;;  %v559_v44 = vadd.f32 %v4552_v21, %v490_v17  ;;  %v356_v45 = vpop.f32.mrf.mxu0  ;;  %v1870_v46 = vperm.slane %v1678_v30, 0  ;;  %v4014_v21 = vld [vmem:[%s5138_s0 + $0xb4] sm:$0xf0]  ;;  %v4046_v6 = vld [vmem:[#allocation2 + $0x68] sm:$0xff] }
  0xd6   :  { %v1969_v12 = vsel %vm1955_vm5, %v1868_v36, %v1867_v28  ;;  %v3494_v47 = vrot.slane %v758_v34, 9  ;;  %v1296_v48 = vmax.f32 %v754_v29, %v3492_v39  ;;  %v423_v62 = vadd.f32 %v4559_v37, %v354_v20  ;;  %3034 = vmatpush.bf16.msrb.mxu3 %v4046_v6 }
  0xd7   :  { %v1970_v49 = vsel %vm1957_vm6, %v1869_v38, %v1969_v12  ;;  %v1297_v51 = vmax.f32 %v756_v31, %v3493_v41  ;;  %v1487_v35 = vrot.slane %v1295_v42, 2  ;;  %v617_v53 = vmax.f32 %v559_v44, 0.0 }
  0xd8   :  { %v1971_v57 = vsel %vm1959_vm7, %v1870_v46, %v1970_v49  ;;  %v1298_v58 = vmax.f32 %v758_v34, %v3494_v47  ;;  %v1488_v59 = vrot.slane %v1296_v48, 2  ;;  %v492_v56 = vadd.f32 %v491_v40, %v4497_v60 }
  0xd9   :  { %v1489_v63 = vrot.slane %v1297_v51, 2  ;;  %v1679_v0 = vmax.f32 %v1295_v42, %v1487_v35  ;;  %v708_v1 = vrot.slane %v617_v53, 6  ;;  %v357_v3 = vadd.f32 %v356_v45, %v4493_v52  ;;  %v4607_v42 = vpop.f32.mrf.mxu3 }
  0xda   :  { %v1490_v2 = vrot.slane %v1298_v58, 2  ;;  %v1680_v61 = vmax.f32 %v1296_v48, %v1488_v59  ;;  %v3378_v4 = vor.u32 %v4014_v21, %v3377_v55  ;;  %v618_v27 = vmax.f32 %v423_v62, 0.0 }
  0xdb   :  { %v1681_v7 = vmax.f32 %v1297_v51, %v1489_v63  ;;  %v1871_v9 = vperm.slane %v1679_v0, 0  ;;  %v759_v10 = vsel %vm728_vm2, %v616_v43, %v708_v1  ;;  %v760_v11 = vsel %vm730_vm3, %v616_v43, %v708_v1  ;;  %v4613_v55 = vpop.f32.mrf.mxu1 }
  0xdc   :  { %v1682_v13 = vmax.f32 %v1298_v58, %v1490_v2  ;;  %v1872_v15 = vperm.slane %v1680_v61, 0  ;;  %v761_v37 = vrot.slane %v760_v11, 2  ;;  %v762_v16 = vsel %vm733_vm4, %v616_v43, %v708_v1  ;;  %395 = vmatmul.bf16.gmra.mxu0 %v3378_v4  ;;  %533 = vmatmul.bf16.gmra.mxu2 %v3378_v4  ;;  %v494_v17 = vpop.f32.mrf.mxu2  ;;  %v4038_v4 = vld [vmem:[#allocation2 + $0x28] sm:$0xff] }
  0xdd   :  { %v1873_v18 = vperm.slane %v1681_v7, 0  ;;  %v1972_v19 = vsel %vm1961_vm8, %v1871_v9, %v1971_v57  ;;  %v763_v50 = vrot.slane %v762_v16, 4  ;;  %v764_v20 = vsel %vm325_vm0, %v708_v1, %v616_v43  ;;  %v358_v23 = vpop.f32.mrf.mxu0  ;;  %v4054_v7 = vld [vmem:[#allocation2 + $0xa8] sm:$0xff]  ;;  %3021 = vmatpush.bf16.msrb.mxu1 %v4038_v4 }
  0xde   :  { %v1973_v24 = vsel %vm1963_vm9, %v1872_v15, %v1972_v19  ;;  %v765_v25 = vrot.slane %v764_v20, 6  ;;  %v3495_v26 = vrot.slane %v759_v10, 9  ;;  %v3496_v29 = vrot.slane %v761_v37, 9  ;;  %3047 = vmatpush.bf16.msrb.mxu0 %v4054_v7 }
  0xdf   :  { %v1974_v28 = vsel %vm1965_vm10, %v1873_v18, %v1973_v24  ;;  %v3497_v30 = vrot.slane %v763_v50, 9  ;;  %v561_v31 = vadd.f32 %v4571_v8, %v492_v56  ;;  %v1874_v32 = vperm.slane %v1682_v13, 0 }
  0xe0   :  { %v3498_v33 = vrot.slane %v765_v25, 9  ;;  %v1299_v36 = vmax.f32 %v759_v10, %v3495_v26  ;;  %v426_v38 = vadd.f32 %v4578_v22, %v357_v3  ;;  %v1300_v34 = vmax.f32 %v761_v37, %v3496_v29 }
  0xe1   :  { %v1301_v39 = vmax.f32 %v763_v50, %v3497_v30  ;;  %v619_v40 = vmax.f32 %v561_v31, 0.0  ;;  %v495_v41 = vadd.f32 %v494_v17, %v4497_v60  ;;  %v4610_v43 = vsel %vm1967_vm11, %v1874_v32, %v1974_v28  ;;  %v4625_v26 = vpop.f32.mrf.mxu3 }
  0xe2   :  { %v1302_v44 = vmax.f32 %v765_v25, %v3498_v33  ;;  %v1491_v45 = vrot.slane %v1299_v36, 2  ;;  %v359_v8 = vadd.f32 %v358_v23, %v4493_v52  ;;  %v1492_v46 = vrot.slane %v1300_v34, 2 }
  0xe3   :  { %v1493_v12 = vrot.slane %v1301_v39, 2  ;;  %v709_v47 = vrot.slane %v619_v40, 6  ;;  %v564_v48 = vadd.f32 %v563_v54, %v495_v41  ;;  %v620_v51 = vmax.f32 %v426_v38, 0.0 }
  0xe4   :  { %v1494_v49 = vrot.slane %v1302_v44, 2  ;;  %v1683_v22 = vmax.f32 %v1299_v36, %v1491_v45  ;;  %v428_v35 = vadd.f32 %v427_v5, %v359_v8  ;;  %v496_v53 = vpop.f32.mrf.mxu2  ;;  %v1684_v21 = vmax.f32 %v1300_v34, %v1492_v46  ;;  %v4062_v5 = vld [vmem:[#allocation2 + $0xe8] sm:$0xff]  ;;  %v432_v45 = vpop.f32.mrf.mxu1 }
  0xe5   :  { %v1685_v57 = vmax.f32 %v1301_v39, %v1493_v12  ;;  %v766_v58 = vsel %vm728_vm2, %v618_v27, %v709_v47  ;;  %v767_v59 = vsel %vm730_vm3, %v618_v27, %v709_v47  ;;  %v361_v62 = vpop.f32.mrf.mxu0  ;;  %v769_v56 = vsel %vm733_vm4, %v618_v27, %v709_v47  ;;  %3060 = vmatpush.bf16.msrb.mxu2 %v4062_v5 }
  0xe6   :  { %v1686_v63 = vmax.f32 %v1302_v44, %v1494_v49  ;;  %v1875_v0 = vperm.slane %v1683_v22, 0  ;;  %v768_v1 = vrot.slane %v767_v59, 2  ;;  %v1876_v54 = vperm.slane %v1684_v21, 0 }
  0xe7   :  { %v1877_v2 = vperm.slane %v1685_v57, 0  ;;  %v770_v61 = vrot.slane %v769_v56, 4  ;;  %v771_v3 = vsel %vm325_vm0, %v709_v47, %v618_v27  ;;  %v3499_v11 = vrot.slane %v766_v58, 9 }
  0xe8   :  { %v1878_v9 = vperm.slane %v1686_v63, 0  ;;  %v772_v10 = vrot.slane %v771_v3, 6  ;;  %v3500_v13 = vrot.slane %v768_v1, 9  ;;  %v1976_v15 = vsel %vm1955_vm5, %v1876_v54, %v1875_v0 }
  0xe9   :  { %v3501_v37 = vrot.slane %v770_v61, 9  ;;  %v621_v16 = vmax.f32 %v564_v48, 0.0  ;;  %v4620_v17 = vmax.f32 %v428_v35, 0.0  ;;  %v1977_v18 = vsel %vm1957_vm6, %v1877_v2, %v1976_v15 }
  0xea   :  { %v3502_v19 = vrot.slane %v772_v10, 9  ;;  %v1303_v50 = vmax.f32 %v766_v58, %v3499_v11  ;;  %v1304_v20 = vmax.f32 %v768_v1, %v3500_v13  ;;  %v1978_v23 = vsel %vm1959_vm7, %v1878_v9, %v1977_v18  ;;  %v4640_v13 = vpop.f32.mrf.mxu3 }
  0xeb   :  { %v1305_v6 = vmax.f32 %v770_v61, %v3501_v37  ;;  %v710_v24 = vrot.slane %v621_v16, 6  ;;  %v497_v25 = vadd.f32 %v496_v53, %v4497_v60  ;;  %v362_v30 = vadd.f32 %v361_v62, %v4493_v52 }
  0xec   :  { %v1306_v27 = vmax.f32 %v772_v10, %v3502_v19  ;;  %v1495_v28 = vrot.slane %v1303_v50, 2  ;;  %v1496_v29 = vrot.slane %v1304_v20, 2  ;;  %v499_v31 = vpop.f32.mrf.mxu2 }
  0xed   :  { %v1497_v32 = vrot.slane %v1305_v6, 2  ;;  %v773_v33 = vsel %vm728_vm2, %v620_v51, %v710_v24  ;;  %v774_v36 = vsel %vm730_vm3, %v620_v51, %v710_v24  ;;  %v776_v38 = vsel %vm733_vm4, %v620_v51, %v710_v24  ;;  %v363_v34 = vpop.f32.mrf.mxu0 }
  0xee   :  { %v1498_v39 = vrot.slane %v1306_v27, 2  ;;  %v1687_v40 = vmax.f32 %v1303_v50, %v1495_v28  ;;  %v1688_v41 = vmax.f32 %v1304_v20, %v1496_v29  ;;  %v775_v44 = vrot.slane %v774_v36, 2 }
  0xef   :  { %v1689_v8 = vmax.f32 %v1305_v6, %v1497_v32  ;;  %v777_v46 = vrot.slane %v776_v38, 4  ;;  %v778_v12 = vsel %vm325_vm0, %v710_v24, %v620_v51  ;;  %v3503_v47 = vrot.slane %v773_v33, 9 }
  0xf0   :  { %v1690_v48 = vmax.f32 %v1306_v27, %v1498_v39  ;;  %v1879_v49 = vperm.slane %v1687_v40, 0  ;;  %v1880_v22 = vperm.slane %v1688_v41, 0  ;;  %v779_v35 = vrot.slane %v778_v12, 6  ;;  %v4650_v27 = vpop.f32.mrf.mxu1 }
  0xf1   :  { %v1881_v53 = vperm.slane %v1689_v8, 0  ;;  %v3504_v21 = vrot.slane %v775_v44, 9  ;;  %v3505_v57 = vrot.slane %v777_v46, 9  ;;  %v1307_v58 = vmax.f32 %v773_v33, %v3503_v47 }
  0xf2   :  { %v1882_v59 = vperm.slane %v1690_v48, 0  ;;  %v1979_v62 = vsel %vm1961_vm8, %v1879_v49, %v1978_v23  ;;  %v3506_v63 = vrot.slane %v779_v35, 9  ;;  %v566_v0 = vadd.f32 %v4607_v42, %v497_v25 }
  0xf3   :  { %v1980_v1 = vsel %vm1963_vm9, %v1880_v22, %v1979_v62  ;;  %v1308_v56 = vmax.f32 %v775_v44, %v3504_v21  ;;  %v1309_v54 = vmax.f32 %v777_v46, %v3505_v57  ;;  %v1499_v51 = vrot.slane %v1307_v58, 2 }
  0xf4   :  { %v1981_v2 = vsel %vm1965_vm10, %v1881_v53, %v1980_v1  ;;  %v1310_v61 = vmax.f32 %v779_v35, %v3506_v63  ;;  %v623_v3 = vmax.f32 %v566_v0, 0.0  ;;  %v431_v4 = vadd.f32 %v4613_v55, %v362_v30  ;;  %v501_v5 = vpop.f32.mrf.mxu2 }
  0xf5   :  { %v4638_v7 = vsel %vm1967_vm11, %v1882_v59, %v1981_v2  ;;  %v1500_v9 = vrot.slane %v1308_v56, 2  ;;  %v1501_v10 = vrot.slane %v1309_v54, 2  ;;  %v1691_v11 = vmax.f32 %v1307_v58, %v1499_v51  ;;  %v366_v42 = vpop.f32.mrf.mxu0 }
  0xf6   :  { %v1502_v15 = vrot.slane %v1310_v61, 2  ;;  %v711_v37 = vrot.slane %v623_v3, 6  ;;  %v624_v16 = vmax.f32 %v431_v4, 0.0  ;;  %v500_v18 = vadd.f32 %v499_v31, %v4497_v60 }
  0xf7   :  { %v1692_v19 = vmax.f32 %v1308_v56, %v1500_v9  ;;  %v1693_v50 = vmax.f32 %v1309_v54, %v1501_v10  ;;  %v1883_v20 = vperm.slane %v1691_v11, 0  ;;  %v364_v55 = vadd.f32 %v363_v34, %v4493_v52  ;;  %v4045_v34 = vld [vmem:[#allocation2 + $0x60] sm:$0xff] }
  0xf8   :  { %v1694_v23 = vmax.f32 %v1310_v61, %v1502_v15  ;;  %v780_v6 = vsel %vm728_vm2, %v4620_v17, %v711_v37  ;;  %v781_v24 = vsel %vm730_vm3, %v4620_v17, %v711_v37  ;;  %v783_v25 = vsel %vm733_vm4, %v4620_v17, %v711_v37  ;;  %3035 = vmatpush.bf16.msrb.mxu3 %v4045_v34  ;;  %v4037_v9 = vld [vmem:[#allocation2 + $0x20] sm:$0xff] }
  0xf9   :  { %v1884_v28 = vperm.slane %v1692_v19, 0  ;;  %v1885_v29 = vperm.slane %v1693_v50, 0  ;;  %v782_v30 = vrot.slane %v781_v24, 2  ;;  %v784_v31 = vrot.slane %v783_v25, 4  ;;  %v4061_v10 = vld [vmem:[#allocation2 + $0xe0] sm:$0xff]  ;;  %3022 = vmatpush.bf16.msrb.mxu1 %v4037_v9 }
  0xfa   :  { %v1886_v32 = vperm.slane %v1694_v23, 0  ;;  %v785_v33 = vsel %vm325_vm0, %v711_v37, %v4620_v17  ;;  %v3507_v36 = vrot.slane %v780_v6, 9  ;;  %v569_v38 = vadd.f32 %v4625_v26, %v500_v18  ;;  %v437_v18 = vpop.f32.mrf.mxu1  ;;  %3061 = vmatpush.bf16.msrb.mxu2 %v4061_v10 }
  0xfb   :  { %v1983_v39 = vsel %vm1955_vm5, %v1884_v28, %v1883_v20  ;;  %v786_v40 = vrot.slane %v785_v33, 6  ;;  %v3508_v41 = vrot.slane %v782_v30, 9  ;;  %v3509_v44 = vrot.slane %v784_v31, 9 }
  0xfc   :  { %v1984_v8 = vsel %vm1957_vm6, %v1885_v29, %v1983_v39  ;;  %v1311_v46 = vmax.f32 %v780_v6, %v3507_v36  ;;  %v625_v12 = vmax.f32 %v569_v38, 0.0  ;;  %v433_v47 = vadd.f32 %v432_v45, %v364_v55  ;;  %v504_v48 = vpop.f32.mrf.mxu2  ;;  %v573_v45 = vpop.f32.mrf.mxu3 }
  0xfd   :  { %v1985_v49 = vsel %vm1959_vm7, %v1886_v32, %v1984_v8  ;;  %v3510_v22 = vrot.slane %v786_v40, 9  ;;  %v1312_v17 = vmax.f32 %v782_v30, %v3508_v41  ;;  %v1313_v35 = vmax.f32 %v784_v31, %v3509_v44  ;;  %v368_v53 = vpop.f32.mrf.mxu0 }
  0xfe   :  { %v1503_v26 = vrot.slane %v1311_v46, 2  ;;  %v712_v21 = vrot.slane %v625_v12, 6  ;;  %v4658_v57 = vmax.f32 %v433_v47, 0.0  ;;  %v502_v58 = vadd.f32 %v501_v5, %v4497_v60  ;;  %v4053_v5 = vld [vmem:[#allocation2 + $0xa0] sm:$0xff] }
  0xff   :  { %v1314_v59 = vmax.f32 %v786_v40, %v3510_v22  ;;  %v1504_v62 = vrot.slane %v1312_v17, 2  ;;  %v1505_v63 = vrot.slane %v1313_v35, 2  ;;  %v367_v0 = vadd.f32 %v366_v42, %v4493_v52  ;;  %3048 = vmatpush.bf16.msrb.mxu0 %v4053_v5 }
 0x100   :  { %v1695_v1 = vmax.f32 %v1311_v46, %v1503_v26  ;;  %v787_v56 = vsel %vm728_vm2, %v624_v16, %v712_v21  ;;  %v788_v54 = vsel %vm730_vm3, %v624_v16, %v712_v21  ;;  %v790_v51 = vsel %vm733_vm4, %v624_v16, %v712_v21 }
 0x101   :  { %v1506_v2 = vrot.slane %v1314_v59, 2  ;;  %v1696_v61 = vmax.f32 %v1312_v17, %v1504_v62  ;;  %v1697_v3 = vmax.f32 %v1313_v35, %v1505_v63  ;;  %v789_v4 = vrot.slane %v788_v54, 2 }
 0x102   :  { %v1887_v11 = vperm.slane %v1695_v1, 0  ;;  %v791_v15 = vrot.slane %v790_v51, 4  ;;  %v792_v37 = vsel %vm325_vm0, %v712_v21, %v624_v16  ;;  %v3511_v42 = vrot.slane %v787_v56, 9  ;;  %v4688_v54 = vpop.f32.mrf.mxu1 }
 0x103   :  { %v1698_v19 = vmax.f32 %v1314_v59, %v1506_v2  ;;  %v1888_v50 = vperm.slane %v1696_v61, 0  ;;  %v1889_v20 = vperm.slane %v1697_v3, 0  ;;  %v793_v55 = vrot.slane %v792_v37, 6 }
 0x104   :  { %v1986_v23 = vsel %vm1961_vm8, %v1887_v11, %v1985_v49  ;;  %v3512_v6 = vrot.slane %v789_v4, 9  ;;  %v3513_v24 = vrot.slane %v791_v15, 9  ;;  %v1315_v25 = vmax.f32 %v787_v56, %v3511_v42  ;;  %v4667_v28 = vpop.f32.mrf.mxu2  ;;  %v4680_v35 = vpop.f32.mrf.mxu3 }
 0x105   :  { %v1890_v29 = vperm.slane %v1698_v19, 0  ;;  %v1987_v30 = vsel %vm1963_vm9, %v1888_v50, %v1986_v23  ;;  %v3514_v16 = vrot.slane %v793_v55, 9  ;;  %v571_v31 = vadd.f32 %v4640_v13, %v502_v58  ;;  %v4676_v44 = vpop.f32.mrf.mxu0 }
 0x106   :  { %v1988_v32 = vsel %vm1965_vm10, %v1889_v20, %v1987_v30  ;;  %v1316_v33 = vmax.f32 %v789_v4, %v3512_v6  ;;  %v1317_v36 = vmax.f32 %v791_v15, %v3513_v24  ;;  %v1507_v38 = vrot.slane %v1315_v25, 2 }
 0x107   :  { %v4673_v34 = vsel %vm1967_vm11, %v1890_v29, %v1988_v32  ;;  %v1318_v39 = vmax.f32 %v793_v55, %v3514_v16  ;;  %v627_v40 = vmax.f32 %v571_v31, 0.0  ;;  %v436_v41 = vadd.f32 %v4650_v27, %v367_v0 }
 0x108   :  { %v1508_v8 = vrot.slane %v1316_v33, 2  ;;  %v1509_v46 = vrot.slane %v1317_v36, 2  ;;  %v1699_v12 = vmax.f32 %v1315_v25, %v1507_v38  ;;  %v505_v47 = vadd.f32 %v504_v48, %v4497_v60 }
 0x109   :  { %v1510_v13 = vrot.slane %v1318_v39, 2  ;;  %v713_v49 = vrot.slane %v627_v40, 6  ;;  %v628_v22 = vmax.f32 %v436_v41, 0.0  ;;  %v369_v17 = vadd.f32 %v368_v53, %v4493_v52 }
 0x10a   :  { %v1700_v26 = vmax.f32 %v1316_v33, %v1508_v8  ;;  %v1701_v21 = vmax.f32 %v1317_v36, %v1509_v46  ;;  %v1891_v58 = vperm.slane %v1699_v12, 0  ;;  %v574_v59 = vadd.f32 %v573_v45, %v505_v47  ;;  %v4044_v46 = vld [vmem:[#allocation2 + $0x58] sm:$0xff] }
 0x10b   :  { %v1702_v62 = vmax.f32 %v1318_v39, %v1510_v13  ;;  %v794_v27 = vsel %vm728_vm2, %v4658_v57, %v713_v49  ;;  %v795_v63 = vsel %vm730_vm3, %v4658_v57, %v713_v49  ;;  %v797_v48 = vsel %vm733_vm4, %v4658_v57, %v713_v49  ;;  %3036 = vmatpush.bf16.msrb.mxu3 %v4044_v46 }
 0x10c   :  { %v1892_v0 = vperm.slane %v1700_v26, 0  ;;  %v1893_v1 = vperm.slane %v1701_v21, 0  ;;  %v796_v56 = vrot.slane %v795_v63, 2  ;;  %v798_v53 = vrot.slane %v797_v48, 4  ;;  %v4690_v51 = vpop.f32.mrf.mxu2  ;;  %v578_v38 = vpop.f32.mrf.mxu3 }
 0x10d   :  { %v1894_v2 = vperm.slane %v1702_v62, 0  ;;  %v799_v45 = vsel %vm325_vm0, %v713_v49, %v4658_v57  ;;  %v3515_v61 = vrot.slane %v794_v27, 9  ;;  %v629_v3 = vmax.f32 %v574_v59, 0.0  ;;  %v373_v25 = vpop.f32.mrf.mxu0  ;;  %v442_v62 = vpop.f32.mrf.mxu1 }
 0x10e   :  { %v1990_v4 = vsel %vm1955_vm5, %v1892_v0, %v1891_v58  ;;  %v800_v9 = vrot.slane %v799_v45, 6  ;;  %v3516_v10 = vrot.slane %v796_v56, 9  ;;  %v3517_v5 = vrot.slane %v798_v53, 9 }
 0x10f   :  { %v1991_v11 = vsel %vm1957_vm6, %v1893_v1, %v1990_v4  ;;  %v1319_v15 = vmax.f32 %v794_v27, %v3515_v61  ;;  %v714_v37 = vrot.slane %v629_v3, 6  ;;  %v438_v42 = vadd.f32 %v437_v18, %v369_v17 }
 0x110   :  { %v1992_v19 = vsel %vm1959_vm7, %v1894_v2, %v1991_v11  ;;  %v3518_v50 = vrot.slane %v800_v9, 9  ;;  %v1320_v20 = vmax.f32 %v796_v56, %v3516_v10  ;;  %v1321_v55 = vmax.f32 %v798_v53, %v3517_v5 }
 0x111   :  { %v1511_v23 = vrot.slane %v1319_v15, 2  ;;  %v801_v57 = vsel %vm728_vm2, %v628_v22, %v714_v37  ;;  %v802_v6 = vsel %vm730_vm3, %v628_v22, %v714_v37  ;;  %v804_v24 = vsel %vm733_vm4, %v628_v22, %v714_v37 }
 0x112   :  { %v1322_v29 = vmax.f32 %v800_v9, %v3518_v50  ;;  %v1512_v30 = vrot.slane %v1320_v20, 2  ;;  %v1513_v16 = vrot.slane %v1321_v55, 2  ;;  %v803_v31 = vrot.slane %v802_v6, 2 }
 0x113   :  { %v1703_v32 = vmax.f32 %v1319_v15, %v1511_v23  ;;  %v805_v33 = vrot.slane %v804_v24, 4  ;;  %v806_v18 = vsel %vm325_vm0, %v714_v37, %v628_v22  ;;  %v3519_v36 = vrot.slane %v801_v57, 9 }
 0x114   :  { %v1514_v39 = vrot.slane %v1322_v29, 2  ;;  %v1704_v40 = vmax.f32 %v1320_v20, %v1512_v30  ;;  %v1705_v41 = vmax.f32 %v1321_v55, %v1513_v16  ;;  %v807_v8 = vrot.slane %v806_v18, 6  ;;  %v511_v12 = vpop.f32.mrf.mxu2  ;;  %v580_v24 = vpop.f32.mrf.mxu3 }
 0x115   :  { %v1895_v47 = vperm.slane %v1703_v32, 0  ;;  %v3520_v13 = vrot.slane %v803_v31, 9  ;;  %v3521_v49 = vrot.slane %v805_v33, 9  ;;  %v1323_v17 = vmax.f32 %v801_v57, %v3519_v36 }
 0x116   :  { %v1706_v26 = vmax.f32 %v1322_v29, %v1514_v39  ;;  %v1896_v21 = vperm.slane %v1704_v40, 0  ;;  %v1897_v58 = vperm.slane %v1705_v41, 0  ;;  %v3522_v59 = vrot.slane %v807_v8, 9  ;;  %v4060_v39 = vld [vmem:[#allocation2 + $0xd8] sm:$0xff]  ;;  %v445_v40 = vpop.f32.mrf.mxu1 }
 0x117   :  { %v1993_v22 = vsel %vm1961_vm8, %v1895_v47, %v1992_v19  ;;  %v1324_v27 = vmax.f32 %v803_v31, %v3520_v13  ;;  %v1325_v63 = vmax.f32 %v805_v33, %v3521_v49  ;;  %v1515_v48 = vrot.slane %v1323_v17, 2  ;;  %v376_v19 = vpop.f32.mrf.mxu0  ;;  %v4052_v41 = vld [vmem:[#allocation2 + $0x98] sm:$0xff]  ;;  %3062 = vmatpush.bf16.msrb.mxu2 %v4060_v39 }
 0x118   :  { %v1898_v0 = vperm.slane %v1706_v26, 0  ;;  %v1994_v1 = vsel %vm1963_vm9, %v1896_v21, %v1993_v22  ;;  %v1326_v56 = vmax.f32 %v807_v8, %v3522_v59  ;;  %v630_v53 = vmax.f32 %v438_v42, 0.0  ;;  %3049 = vmatpush.bf16.msrb.mxu0 %v4052_v41 }
 0x119   :  { %v1995_v2 = vsel %vm1965_vm10, %v1897_v58, %v1994_v1  ;;  %v1516_v45 = vrot.slane %v1324_v27, 2  ;;  %v1517_v61 = vrot.slane %v1325_v63, 2  ;;  %v1707_v3 = vmax.f32 %v1323_v17, %v1515_v48 }
 0x11a   :  { %v4705_v4 = vsel %vm1967_vm11, %v1898_v0, %v1995_v2  ;;  %v1518_v9 = vrot.slane %v1326_v56, 2  ;;  %v507_v10 = vadd.f32 %v4667_v28, %v4497_v60  ;;  %v372_v5 = vadd.f32 %v4676_v44, %v4493_v52 }
 0x11b   :  { %v1708_v11 = vmax.f32 %v1324_v27, %v1516_v45  ;;  %v1709_v15 = vmax.f32 %v1325_v63, %v1517_v61  ;;  %v1899_v37 = vperm.slane %v1707_v3, 0  ;;  %v510_v42 = vadd.f32 %v4690_v51, %v4497_v60 }
 0x11c   :  { %v1710_v50 = vmax.f32 %v1326_v56, %v1518_v9  ;;  %v576_v20 = vadd.f32 %v4680_v35, %v507_v10  ;;  %v441_v55 = vadd.f32 %v4688_v54, %v372_v5  ;;  %v374_v23 = vadd.f32 %v373_v25, %v4493_v52  ;;  %v514_v29 = vpop.f32.mrf.mxu2 }
 0x11d   :  { %v1900_v57 = vperm.slane %v1708_v11, 0  ;;  %v1901_v6 = vperm.slane %v1709_v15, 0  ;;  %v579_v28 = vadd.f32 %v578_v38, %v510_v42  ;;  %v512_v44 = vadd.f32 %v511_v12, %v4497_v60  ;;  %v4036_v38 = vld [vmem:[#allocation2 + $0x18] sm:$0xff]  ;;  %v583_v42 = vpop.f32.mrf.mxu3 }
 0x11e   :  { %v1902_v30 = vperm.slane %v1710_v50, 0  ;;  %v631_v16 = vmax.f32 %v576_v20, 0.0  ;;  %v632_v31 = vmax.f32 %v441_v55, 0.0  ;;  %v443_v32 = vadd.f32 %v442_v62, %v374_v23  ;;  %3023 = vmatpush.bf16.msrb.mxu1 %v4036_v38 }
 0x11f   :  { %v1997_v51 = vsel %vm1955_vm5, %v1900_v57, %v1899_v37  ;;  %v633_v33 = vmax.f32 %v579_v28, 0.0  ;;  %v4718_v18 = vadd.f32 %v580_v24, %v512_v44  ;;  %v377_v35 = vadd.f32 %v376_v19, %v4493_v52 }
 0x120   :  { %v1998_v54 = vsel %vm1957_vm6, %v1901_v6, %v1997_v51  ;;  %v715_v25 = vrot.slane %v631_v16, 6  ;;  %v4722_v36 = vmax.f32 %v443_v32, 0.0  ;;  %v4725_v8 = vadd.f32 %v514_v29, %v4497_v60 }
 0x121   :  { %v1999_v46 = vsel %vm1959_vm7, %v1902_v30, %v1998_v54  ;;  %v716_v12 = vrot.slane %v633_v33, 6  ;;  %v635_v47 = vmax.f32 %v4718_v18, 0.0  ;;  %v446_v13 = vadd.f32 %v445_v40, %v377_v35  ;;  %v447_v33 = vpop.f32.mrf.mxu1 }
 0x122   :  { %v808_v49 = vsel %vm728_vm2, %v630_v53, %v715_v25  ;;  %v809_v17 = vsel %vm730_vm3, %v630_v53, %v715_v25  ;;  %v811_v26 = vsel %vm733_vm4, %v630_v53, %v715_v25  ;;  %v813_v21 = vsel %vm325_vm0, %v715_v25, %v630_v53  ;;  %v4737_v53 = vpop.f32.mrf.mxu0 }
 0x123   :  { %v810_v58 = vrot.slane %v809_v17, 2  ;;  %v812_v59 = vrot.slane %v811_v26, 4  ;;  %v814_v62 = vrot.slane %v813_v21, 6  ;;  %v3523_v22 = vrot.slane %v808_v49, 9 }
 0x124   :  { %v815_v27 = vsel %vm728_vm2, %v632_v31, %v716_v12  ;;  %v816_v63 = vsel %vm730_vm3, %v632_v31, %v716_v12  ;;  %v818_v48 = vsel %vm733_vm4, %v632_v31, %v716_v12  ;;  %v820_v0 = vsel %vm325_vm0, %v716_v12, %v632_v31  ;;  %v516_v35 = vpop.f32.mrf.mxu2 }
 0x125   :  { %v3524_v1 = vrot.slane %v810_v58, 9  ;;  %v3525_v56 = vrot.slane %v812_v59, 9  ;;  %v3526_v2 = vrot.slane %v814_v62, 9  ;;  %v1327_v45 = vmax.f32 %v808_v49, %v3523_v22 }
 0x126   :  { %v817_v61 = vrot.slane %v816_v63, 2  ;;  %v819_v3 = vrot.slane %v818_v48, 4  ;;  %v821_v9 = vrot.slane %v820_v0, 6  ;;  %v3527_v10 = vrot.slane %v815_v27, 9 }
 0x127   :  { %v1328_v5 = vmax.f32 %v810_v58, %v3524_v1  ;;  %v1329_v11 = vmax.f32 %v812_v59, %v3525_v56  ;;  %v1330_v15 = vmax.f32 %v814_v62, %v3526_v2  ;;  %v1519_v37 = vrot.slane %v1327_v45, 2 }
 0x128   :  { %v3528_v19 = vrot.slane %v817_v61, 9  ;;  %v3529_v50 = vrot.slane %v819_v3, 9  ;;  %v3530_v20 = vrot.slane %v821_v9, 9  ;;  %v1331_v55 = vmax.f32 %v815_v27, %v3527_v10 }
 0x129   :  { %v1520_v23 = vrot.slane %v1328_v5, 2  ;;  %v1521_v57 = vrot.slane %v1329_v11, 2  ;;  %v1522_v6 = vrot.slane %v1330_v15, 2  ;;  %v1711_v28 = vmax.f32 %v1327_v45, %v1519_v37 }
 0x12a   :  { %v1332_v24 = vmax.f32 %v817_v61, %v3528_v19  ;;  %v1333_v44 = vmax.f32 %v819_v3, %v3529_v50  ;;  %v1334_v29 = vmax.f32 %v821_v9, %v3530_v20  ;;  %v1523_v30 = vrot.slane %v1331_v55, 2  ;;  %v381_v63 = vpop.f32.mrf.mxu0  ;;  %v4043_v50 = vld [vmem:[#allocation2 + $0x50] sm:$0xff] }
 0x12b   :  { %v1712_v16 = vmax.f32 %v1328_v5, %v1520_v23  ;;  %v1713_v31 = vmax.f32 %v1329_v11, %v1521_v57  ;;  %v1714_v32 = vmax.f32 %v1330_v15, %v1522_v6  ;;  %v1903_v51 = vperm.slane %v1711_v28, 0  ;;  %v450_v6 = vpop.f32.mrf.mxu1  ;;  %3037 = vmatpush.bf16.msrb.mxu3 %v4043_v50 }
 0x12c   :  { %v1524_v54 = vrot.slane %v1332_v24, 2  ;;  %v1525_v25 = vrot.slane %v1333_v44, 2  ;;  %v1526_v38 = vrot.slane %v1334_v29, 2  ;;  %v1715_v39 = vmax.f32 %v1331_v55, %v1523_v30 }
 0x12d   :  { %v1904_v40 = vperm.slane %v1712_v16, 0  ;;  %v1905_v41 = vperm.slane %v1713_v31, 0  ;;  %v1906_v12 = vperm.slane %v1714_v32, 0  ;;  %v2000_v49 = vsel %vm1961_vm8, %v1903_v51, %v1999_v46 }
 0x12e   :  { %v1716_v17 = vmax.f32 %v1332_v24, %v1524_v54  ;;  %v1717_v26 = vmax.f32 %v1333_v44, %v1525_v25  ;;  %v1718_v21 = vmax.f32 %v1334_v29, %v1526_v38  ;;  %v1907_v58 = vperm.slane %v1715_v39, 0 }
 0x12f   :  { %v2001_v59 = vsel %vm1963_vm9, %v1904_v40, %v2000_v49  ;;  %v717_v62 = vrot.slane %v635_v47, 6  ;;  %v636_v22 = vmax.f32 %v446_v13, 0.0  ;;  %v584_v27 = vadd.f32 %v583_v42, %v4725_v8  ;;  %v4754_v47 = vpop.f32.mrf.mxu3 }
 0x130   :  { %v2002_v48 = vsel %vm1965_vm10, %v1905_v41, %v2001_v59  ;;  %v1908_v0 = vperm.slane %v1716_v17, 0  ;;  %v1909_v1 = vperm.slane %v1717_v26, 0  ;;  %v1910_v56 = vperm.slane %v1718_v21, 0 }
 0x131   :  { %v4746_v46 = vsel %vm1967_vm11, %v1906_v12, %v2002_v48  ;;  %v822_v2 = vsel %vm728_vm2, %v4722_v36, %v717_v62  ;;  %v823_v45 = vsel %vm730_vm3, %v4722_v36, %v717_v62  ;;  %v825_v18 = vsel %vm733_vm4, %v4722_v36, %v717_v62  ;;  %v4051_v48 = vld [vmem:[#allocation2 + $0x90] sm:$0xff] }
 0x132   :  { %v2004_v8 = vsel %vm1955_vm5, %v1908_v0, %v1907_v58  ;;  %v824_v13 = vrot.slane %v823_v45, 2  ;;  %v826_v61 = vrot.slane %v825_v18, 4  ;;  %v827_v3 = vsel %vm325_vm0, %v717_v62, %v4722_v36  ;;  %v519_v36 = vpop.f32.mrf.mxu2  ;;  %3050 = vmatpush.bf16.msrb.mxu0 %v4051_v48 }
 0x133   :  { %v2005_v9 = vsel %vm1957_vm6, %v1909_v1, %v2004_v8  ;;  %v828_v10 = vrot.slane %v827_v3, 6  ;;  %v3531_v5 = vrot.slane %v822_v2, 9  ;;  %v637_v11 = vmax.f32 %v584_v27, 0.0  ;;  %v4035_v27 = vld [vmem:[#allocation2 + $0x10] sm:$0xff] }
 0x134   :  { %v2006_v15 = vsel %vm1959_vm7, %v1910_v56, %v2005_v9  ;;  %v3532_v37 = vrot.slane %v824_v13, 9  ;;  %v3533_v42 = vrot.slane %v826_v61, 9  ;;  %v379_v19 = vadd.f32 %v4737_v53, %v4493_v52  ;;  %3024 = vmatpush.bf16.msrb.mxu1 %v4035_v27 }
 0x135   :  { %v3534_v20 = vrot.slane %v828_v10, 9  ;;  %v1335_v55 = vmax.f32 %v822_v2, %v3531_v5  ;;  %v718_v23 = vrot.slane %v637_v11, 6  ;;  %v517_v57 = vadd.f32 %v516_v35, %v4497_v60 }
 0x136   :  { %v1336_v28 = vmax.f32 %v824_v13, %v3532_v37  ;;  %v1337_v24 = vmax.f32 %v826_v61, %v3533_v42  ;;  %v448_v44 = vadd.f32 %v447_v33, %v379_v19  ;;  %v382_v29 = vadd.f32 %v381_v63, %v4493_v52  ;;  %v383_v33 = vpop.f32.mrf.mxu0  ;;  %v4059_v63 = vld [vmem:[#allocation2 + $0xd0] sm:$0xff]  ;;  %v452_v37 = vpop.f32.mrf.mxu1 }
 0x137   :  { %v1338_v30 = vmax.f32 %v828_v10, %v3534_v20  ;;  %v1527_v16 = vrot.slane %v1335_v55, 2  ;;  %v829_v31 = vsel %vm728_vm2, %v636_v22, %v718_v23  ;;  %v830_v53 = vsel %vm730_vm3, %v636_v22, %v718_v23  ;;  %v588_v62 = vpop.f32.mrf.mxu3  ;;  %3063 = vmatpush.bf16.msrb.mxu2 %v4059_v63 }
 0x138   :  { %v1528_v32 = vrot.slane %v1336_v28, 2  ;;  %v1529_v51 = vrot.slane %v1337_v24, 2  ;;  %v831_v54 = vrot.slane %v830_v53, 2  ;;  %v832_v25 = vsel %vm733_vm4, %v636_v22, %v718_v23 }
 0x139   :  { %v1530_v35 = vrot.slane %v1338_v30, 2  ;;  %v1719_v38 = vmax.f32 %v1335_v55, %v1527_v16  ;;  %v833_v39 = vrot.slane %v832_v25, 4  ;;  %v834_v40 = vsel %vm325_vm0, %v718_v23, %v636_v22 }
 0x13a   :  { %v1720_v41 = vmax.f32 %v1336_v28, %v1528_v32  ;;  %v1721_v12 = vmax.f32 %v1337_v24, %v1529_v51  ;;  %v835_v49 = vrot.slane %v834_v40, 6  ;;  %v3535_v17 = vrot.slane %v829_v31, 9  ;;  %v521_v42 = vpop.f32.mrf.mxu2 }
 0x13b   :  { %v1722_v26 = vmax.f32 %v1338_v30, %v1530_v35  ;;  %v1911_v21 = vperm.slane %v1719_v38, 0  ;;  %v3536_v58 = vrot.slane %v831_v54, 9  ;;  %v3537_v59 = vrot.slane %v833_v39, 9 }
 0x13c   :  { %v1912_v0 = vperm.slane %v1720_v41, 0  ;;  %v1913_v1 = vperm.slane %v1721_v12, 0  ;;  %v3538_v56 = vrot.slane %v835_v49, 9  ;;  %v1339_v2 = vmax.f32 %v829_v31, %v3535_v17 }
 0x13d   :  { %v2007_v45 = vsel %vm1961_vm8, %v1911_v21, %v2006_v15  ;;  %v1340_v22 = vmax.f32 %v831_v54, %v3536_v58  ;;  %v1341_v18 = vmax.f32 %v833_v39, %v3537_v59  ;;  %v1914_v8 = vperm.slane %v1722_v26, 0 }
 0x13e   :  { %v2008_v13 = vsel %vm1963_vm9, %v1912_v0, %v2007_v45  ;;  %v1342_v61 = vmax.f32 %v835_v49, %v3538_v56  ;;  %v1531_v3 = vrot.slane %v1339_v2, 2  ;;  %v586_v11 = vadd.f32 %v4754_v47, %v517_v57  ;;  %v386_v54 = vpop.f32.mrf.mxu0 }
 0x13f   :  { %v2009_v9 = vsel %vm1965_vm10, %v1913_v1, %v2008_v13  ;;  %v1532_v10 = vrot.slane %v1340_v22, 2  ;;  %v1533_v5 = vrot.slane %v1341_v18, 2  ;;  %v638_v20 = vmax.f32 %v448_v44, 0.0 }
 0x140   :  { %v4774_v15 = vsel %vm1967_vm11, %v1914_v8, %v2009_v9  ;;  %v1534_v19 = vrot.slane %v1342_v61, 2  ;;  %v1723_v50 = vmax.f32 %v1339_v2, %v1531_v3  ;;  %v639_v28 = vmax.f32 %v586_v11, 0.0  ;;  %v455_v2 = vpop.f32.mrf.mxu1  ;;  %v4034_v11 = vld [vmem:[#allocation2 + $0x8] sm:$0xff] }
 0x141   :  { %v1724_v55 = vmax.f32 %v1340_v22, %v1532_v10  ;;  %v1725_v23 = vmax.f32 %v1341_v18, %v1533_v5  ;;  %v520_v24 = vadd.f32 %v519_v36, %v4497_v60  ;;  %v451_v31 = vadd.f32 %v450_v6, %v382_v29  ;;  %v590_v29 = vpop.f32.mrf.mxu3  ;;  %v4042_v5 = vld [vmem:[#allocation2 + $0x48] sm:$0xff]  ;;  %3025 = vmatpush.bf16.msrb.mxu1 %v4034_v11  ;;  %v4096_v11 = vld [vmem:[#allocation2 + $0x1f8] sm:$0xff] }
 0x142   :  { %v1726_v30 = vmax.f32 %v1342_v61, %v1534_v19  ;;  %v1915_v16 = vperm.slane %v1723_v50, 0  ;;  %v384_v53 = vadd.f32 %v383_v33, %v4493_v52  ;;  %v719_v57 = vrot.slane %v639_v28, 6  ;;  %v524_v45 = vpop.f32.mrf.mxu2  ;;  %3038 = vmatpush.bf16.msrb.mxu3 %v4042_v5  ;;  %v4088_v5 = vld [vmem:[#allocation2 + $0x1b8] sm:$0xff] }
 0x143   :  { %v1916_v32 = vperm.slane %v1724_v55, 0  ;;  %v1917_v47 = vperm.slane %v1725_v23, 0  ;;  %v589_v51 = vadd.f32 %v588_v62, %v520_v24  ;;  %v522_v38 = vadd.f32 %v521_v42, %v4497_v60  ;;  %v4050_v55 = vld [vmem:[#allocation2 + $0x88] sm:$0xff] }
 0x144   :  { %v1918_v25 = vperm.slane %v1726_v30, 0  ;;  %v453_v35 = vadd.f32 %v452_v37, %v384_v53  ;;  %v387_v44 = vadd.f32 %v386_v54, %v4493_v52  ;;  %v836_v36 = vsel %vm728_vm2, %v638_v20, %v719_v57  ;;  %v4058_v37 = vld [vmem:[#allocation2 + $0xc8] sm:$0xff]  ;;  %3051 = vmatpush.bf16.msrb.mxu0 %v4050_v55 }
 0x145   :  { %v2011_v39 = vsel %vm1955_vm5, %v1916_v32, %v1915_v16  ;;  %v837_v40 = vsel %vm730_vm3, %v638_v20, %v719_v57  ;;  %v839_v6 = vsel %vm733_vm4, %v638_v20, %v719_v57  ;;  %v841_v49 = vsel %vm325_vm0, %v719_v57, %v638_v20  ;;  %3064 = vmatpush.bf16.msrb.mxu2 %v4058_v37 }
 0x146   :  { %v2012_v33 = vsel %vm1957_vm6, %v1917_v47, %v2011_v39  ;;  %v838_v41 = vrot.slane %v837_v40, 2  ;;  %v840_v12 = vrot.slane %v839_v6, 4  ;;  %v842_v17 = vrot.slane %v841_v49, 6 }
 0x147   :  { %v3539_v26 = vrot.slane %v836_v36, 9  ;;  %v640_v21 = vmax.f32 %v451_v31, 0.0  ;;  %v641_v58 = vmax.f32 %v589_v51, 0.0  ;;  %v2013_v59 = vsel %vm1959_vm7, %v1918_v25, %v2012_v33 }
 0x148   :  { %v3540_v62 = vrot.slane %v838_v41, 9  ;;  %v3541_v27 = vrot.slane %v840_v12, 9  ;;  %v591_v63 = vadd.f32 %v590_v29, %v522_v38  ;;  %v3542_v48 = vrot.slane %v842_v17, 9 }
 0x149   :  { %v1343_v0 = vmax.f32 %v836_v36, %v3539_v26  ;;  %v720_v1 = vrot.slane %v641_v58, 6  ;;  %v4787_v56 = vmax.f32 %v453_v35, 0.0  ;;  %v456_v13 = vadd.f32 %v455_v2, %v387_v44  ;;  %v593_v25 = vpop.f32.mrf.mxu3  ;;  %v388_v35 = vpop.f32.mrf.mxu0 }
 0x14a   :  { %v1344_v22 = vmax.f32 %v838_v41, %v3540_v62  ;;  %v1345_v18 = vmax.f32 %v840_v12, %v3541_v27  ;;  %v643_v8 = vmax.f32 %v591_v63, 0.0  ;;  %v1346_v61 = vmax.f32 %v842_v17, %v3542_v48  ;;  %v526_v27 = vpop.f32.mrf.mxu2  ;;  %v4033_v63 = vld [vmem:[#allocation2] sm:$0xff] }
 0x14b   :  { %v1535_v3 = vrot.slane %v1343_v0, 2  ;;  %v843_v9 = vsel %vm728_vm2, %v640_v21, %v720_v1  ;;  %v844_v10 = vsel %vm730_vm3, %v640_v21, %v720_v1  ;;  %v846_v20 = vsel %vm733_vm4, %v640_v21, %v720_v1  ;;  %v4041_v48 = vld [vmem:[#allocation2 + $0x40] sm:$0xff]  ;;  %3026 = vmatpush.bf16.msrb.mxu1 %v4033_v63  ;;  %v4078_v63 = vld [vmem:[#allocation2 + $0x168] sm:$0xff] }
 0x14c   :  { %v1536_v42 = vrot.slane %v1344_v22, 2  ;;  %v1537_v19 = vrot.slane %v1345_v18, 2  ;;  %v845_v50 = vrot.slane %v844_v10, 2  ;;  %v1538_v23 = vrot.slane %v1346_v61, 2  ;;  %3039 = vmatpush.bf16.msrb.mxu3 %v4041_v48  ;;  %v4086_v48 = vld [vmem:[#allocation2 + $0x1a8] sm:$0xff] }
 0x14d   :  { %v1727_v28 = vmax.f32 %v1343_v0, %v1535_v3  ;;  %v847_v24 = vrot.slane %v846_v20, 4  ;;  %v848_v30 = vsel %vm325_vm0, %v720_v1, %v640_v21  ;;  %v3543_v32 = vrot.slane %v843_v9, 9  ;;  %v4049_v0 = vld [vmem:[#allocation2 + $0x80] sm:$0xff] }
 0x14e   :  { %v1728_v16 = vmax.f32 %v1344_v22, %v1536_v42  ;;  %v1729_v31 = vmax.f32 %v1345_v18, %v1537_v19  ;;  %v849_v53 = vrot.slane %v848_v30, 6  ;;  %v4793_v47 = vmax.f32 %v1346_v61, %v1538_v23  ;;  %v4057_v22 = vld [vmem:[#allocation2 + $0xc0] sm:$0xff]  ;;  %v4072_v18 = vld [vmem:[#allocation2 + $0x138] sm:$0xff]  ;;  %3052 = vmatpush.bf16.msrb.mxu0 %v4049_v0 }
 0x14f   :  { %v1919_v57 = vperm.slane %v1727_v28, 0  ;;  %v3544_v51 = vrot.slane %v845_v50, 9  ;;  %v3545_v54 = vrot.slane %v847_v24, 9  ;;  %v1347_v36 = vmax.f32 %v843_v9, %v3543_v32  ;;  %3065 = vmatpush.bf16.msrb.mxu2 %v4057_v22  ;;  %3071 = vmatpush.bf16.msra.mxu1 %v4072_v18  ;;  %v4079_v32 = vld [vmem:[#allocation2 + $0x170] sm:$0xff] }
 0x150   :  { %v1920_v38 = vperm.slane %v1728_v16, 0  ;;  %v1921_v44 = vperm.slane %v1729_v31, 0  ;;  %v3546_v39 = vrot.slane %v849_v53, 9  ;;  %v525_v33 = vadd.f32 %v524_v45, %v4497_v60 }
 0x151   :  { %v2014_v40 = vsel %vm1961_vm8, %v1919_v57, %v2013_v59  ;;  %v1348_v6 = vmax.f32 %v845_v50, %v3544_v51  ;;  %v1349_v29 = vmax.f32 %v847_v24, %v3545_v54  ;;  %v1539_v49 = vrot.slane %v1347_v36, 2 }
 0x152   :  { %v2015_v41 = vsel %vm1963_vm9, %v1920_v38, %v2014_v40  ;;  %v1350_v12 = vmax.f32 %v849_v53, %v3546_v39  ;;  %v721_v17 = vrot.slane %v643_v8, 6  ;;  %v1922_v26 = vperm.slane %v4793_v47, 0  ;;  %v4080_v8 = vld [vmem:[#allocation2 + $0x178] sm:$0xff]  ;;  %3097 = vmatpush.bf16.msra.mxu0 %v4088_v5  ;;  %v4071_v53 = vld [vmem:[#allocation2 + $0x130] sm:$0xff]  ;;  %v595_v38 = vpop.f32.mrf.mxu3 }
 0x153   :  { %v2016_v21 = vsel %vm1965_vm10, %v1921_v44, %v2015_v41  ;;  %v1540_v58 = vrot.slane %v1348_v6, 2  ;;  %v1541_v62 = vrot.slane %v1349_v29, 2  ;;  %v1731_v1 = vmax.f32 %v1347_v36, %v1539_v49  ;;  %3084 = vmatpush.bf16.msra.mxu3 %v4080_v8  ;;  %v391_v44 = vpop.f32.mrf.mxu0  ;;  %3110 = vmatpush.bf16.msra.mxu2 %v4096_v11  ;;  %v4095_v39 = vld [vmem:[#allocation2 + $0x1f0] sm:$0xff] }
 0x154   :  { %v1542_v59 = vrot.slane %v1350_v12, 2  ;;  %v850_v2 = vsel %vm728_vm2, %v4787_v56, %v721_v17  ;;  %v4802_v45 = vmax.f32 %v456_v13, 0.0  ;;  %v851_v9 = vsel %vm730_vm3, %v4787_v56, %v721_v17  ;;  %v457_v13 = vpop.f32.mrf.mxu1  ;;  %3072 = vmatpush.bf16.msra.mxu1 %v4071_v53 }
 0x155   :  { %v1732_v61 = vmax.f32 %v1348_v6, %v1540_v58  ;;  %v1733_v3 = vmax.f32 %v1349_v29, %v1541_v62  ;;  %v853_v10 = vsel %vm733_vm4, %v4787_v56, %v721_v17  ;;  %v1923_v42 = vperm.slane %v1731_v1, 0  ;;  %v4070_v62 = vld [vmem:[#allocation2 + $0x128] sm:$0xff] }
 0x156   :  { %v1734_v37 = vmax.f32 %v1350_v12, %v1542_v59  ;;  %v852_v19 = vrot.slane %v851_v9, 2  ;;  %v854_v50 = vrot.slane %v853_v10, 4  ;;  %v855_v23 = vsel %vm325_vm0, %v721_v17, %v4787_v56  ;;  %v4087_v56 = vld [vmem:[#allocation2 + $0x1b0] sm:$0xff] }
 0x157   :  { %v1924_v20 = vperm.slane %v1732_v61, 0  ;;  %v1925_v55 = vperm.slane %v1733_v3, 0  ;;  %v3547_v28 = vrot.slane %v850_v2, 9  ;;  %v856_v30 = vrot.slane %v855_v23, 6  ;;  %3085 = vmatpush.bf16.msra.mxu3 %v4079_v32  ;;  %3098 = vmatpush.bf16.msra.mxu0 %v4087_v56 }
 0x158   :  { %v1926_v24 = vperm.slane %v1734_v37, 0  ;;  %v3548_v16 = vrot.slane %v852_v19, 9  ;;  %v3549_v31 = vrot.slane %v854_v50, 9  ;;  %v594_v51 = vadd.f32 %v593_v25, %v525_v33  ;;  %3111 = vmatpush.bf16.msra.mxu2 %v4095_v39  ;;  %3073 = vmatpush.bf16.msra.mxu1 %v4070_v62 }
 0x159   :  { %v2018_v47 = vsel %vm1955_vm5, %v1924_v20, %v1923_v42  ;;  %v1351_v57 = vmax.f32 %v850_v2, %v3547_v28  ;;  %v389_v54 = vadd.f32 %v388_v35, %v4493_v52  ;;  %v3550_v40 = vrot.slane %v856_v30, 9  ;;  %v4094_v2 = vld [vmem:[#allocation2 + $0x1e8] sm:$0xff]  ;;  %v4085_v20 = vld [vmem:[#allocation2 + $0x1a0] sm:$0xff] }
 0x15a   :  { %v2019_v36 = vsel %vm1957_vm6, %v1925_v55, %v2018_v47  ;;  %v1352_v6 = vmax.f32 %v852_v19, %v3548_v16  ;;  %v1353_v29 = vmax.f32 %v854_v50, %v3549_v31  ;;  %v4814_v41 = vsel %vm1967_vm11, %v1922_v26, %v2016_v21  ;;  %v529_v21 = vpop.f32.mrf.mxu2  ;;  %v4069_v50 = vld [vmem:[#allocation2 + $0x120] sm:$0xff] }
 0x15b   :  { %v2020_v12 = vsel %vm1959_vm7, %v1926_v24, %v2019_v36  ;;  %v1543_v49 = vrot.slane %v1351_v57, 2  ;;  %v645_v17 = vmax.f32 %v594_v51, 0.0  ;;  %v1354_v25 = vmax.f32 %v856_v30, %v3550_v40  ;;  %3086 = vmatpush.bf16.msra.mxu3 %v4078_v63  ;;  %3099 = vmatpush.bf16.msra.mxu0 %v4086_v48  ;;  %v4093_v30 = vld [vmem:[#allocation2 + $0x1e0] sm:$0xff]  ;;  %v4092_v63 = vld [vmem:[#allocation2 + $0x1d8] sm:$0xff] }
 0x15c   :  { %v1544_v35 = vrot.slane %v1352_v6, 2  ;;  %v1545_v33 = vrot.slane %v1353_v29, 2  ;;  %v527_v58 = vadd.f32 %v526_v27, %v4497_v60  ;;  %v458_v1 = vadd.f32 %v457_v13, %v389_v54  ;;  %v460_v19 = vpop.f32.mrf.mxu1  ;;  %v4077_v13 = vld [vmem:[#allocation2 + $0x160] sm:$0xff]  ;;  %3112 = vmatpush.bf16.msra.mxu2 %v4094_v2  ;;  %3074 = vmatpush.bf16.msra.mxu1 %v4069_v50 }
 0x15d   :  { %v1735_v0 = vmax.f32 %v1351_v57, %v1543_v49  ;;  %v722_v59 = vrot.slane %v645_v17, 6  ;;  %v392_v26 = vadd.f32 %v391_v44, %v4493_v52  ;;  %v1546_v22 = vrot.slane %v1354_v25, 2  ;;  %v393_v44 = vpop.f32.mrf.mxu0  ;;  %v4068_v49 = vld [vmem:[#allocation2 + $0x118] sm:$0xff] }
 0x15e   :  { %v1736_v18 = vmax.f32 %v1352_v6, %v1544_v35  ;;  %v1737_v8 = vmax.f32 %v1353_v29, %v1545_v33  ;;  %v596_v61 = vadd.f32 %v595_v38, %v527_v58  ;;  %v646_v32 = vmax.f32 %v458_v1, 0.0  ;;  %v598_v38 = vpop.f32.mrf.mxu3  ;;  %v4076_v17 = vld [vmem:[#allocation2 + $0x158] sm:$0xff] }
 0x15f   :  { %v1927_v3 = vperm.slane %v1735_v0, 0  ;;  %v857_v27 = vsel %vm728_vm2, %v4802_v45, %v722_v59  ;;  %v858_v9 = vsel %vm730_vm3, %v4802_v45, %v722_v59  ;;  %v860_v10 = vsel %vm733_vm4, %v4802_v45, %v722_v59  ;;  %3087 = vmatpush.bf16.msra.mxu3 %v4077_v13  ;;  %3100 = vmatpush.bf16.msra.mxu0 %v4085_v20  ;;  %v4091_v20 = vld [vmem:[#allocation2 + $0x1d0] sm:$0xff] }
 0x160   :  { %v4825_v5 = vmax.f32 %v1354_v25, %v1546_v22  ;;  %v1928_v11 = vperm.slane %v1736_v18, 0  ;;  %v1929_v37 = vperm.slane %v1737_v8, 0  ;;  %v859_v42 = vrot.slane %v858_v9, 2  ;;  %3113 = vmatpush.bf16.msra.mxu2 %v4093_v30  ;;  %v4084_v25 = vld [vmem:[#allocation2 + $0x198] sm:$0xff]  ;;  %3075 = vmatpush.bf16.msra.mxu1 %v4068_v49  ;;  %v4067_v9 = vld [vmem:[#allocation2 + $0x110] sm:$0xff]  ;;  %v4090_v49 = vld [vmem:[#allocation2 + $0x1c8] sm:$0xff] }
 0x161   :  { %v2021_v55 = vsel %vm1961_vm8, %v1927_v3, %v2020_v12  ;;  %v861_v23 = vrot.slane %v860_v10, 4  ;;  %v862_v28 = vsel %vm325_vm0, %v722_v59, %v4802_v45  ;;  %v3551_v24 = vrot.slane %v857_v27, 9  ;;  %v4075_v10 = vld [vmem:[#allocation2 + $0x150] sm:$0xff] }
 0x162   :  { %v2022_v16 = vsel %vm1963_vm9, %v1928_v11, %v2021_v55  ;;  %v863_v31 = vrot.slane %v862_v28, 6  ;;  %v3552_v53 = vrot.slane %v859_v42, 9  ;;  %v1930_v47 = vperm.slane %v4825_v5, 0  ;;  %v4083_v11 = vld [vmem:[#allocation2 + $0x190] sm:$0xff] }
 0x163   :  { %v3553_v57 = vrot.slane %v861_v23, 9  ;;  %v1355_v51 = vmax.f32 %v857_v27, %v3551_v24  ;;  %v647_v54 = vmax.f32 %v596_v61, 0.0  ;;  %v4833_v56 = vsel %vm1965_vm10, %v1929_v37, %v2022_v16  ;;  %3088 = vmatpush.bf16.msra.mxu3 %v4076_v17  ;;  %3101 = vmatpush.bf16.msra.mxu0 %v4084_v25 }
 0x164   :  { %v3554_v45 = vrot.slane %v863_v31, 9  ;;  %v1356_v39 = vmax.f32 %v859_v42, %v3552_v53  ;;  %v461_v36 = vadd.f32 %v460_v19, %v392_v26  ;;  %v530_v12 = vadd.f32 %v529_v21, %v4497_v60  ;;  %v531_v26 = vpop.f32.mrf.mxu2  ;;  %3114 = vmatpush.bf16.msra.mxu2 %v4092_v63  ;;  %v462_v13 = vpop.f32.mrf.mxu1  ;;  %3076 = vmatpush.bf16.msra.mxu1 %v4067_v9 }
 0x165   :  { %v1357_v40 = vmax.f32 %v861_v23, %v3553_v57  ;;  %v1547_v6 = vrot.slane %v1355_v51, 2  ;;  %v723_v29 = vrot.slane %v647_v54, 6  ;;  %v394_v62 = vadd.f32 %v393_v44, %v4493_v52 }
 0x166   :  { %v1358_v35 = vmax.f32 %v863_v31, %v3554_v45  ;;  %v1548_v33 = vrot.slane %v1356_v39, 2  ;;  %v4836_v58 = vmax.f32 %v461_v36, 0.0  ;;  %v599_v24 = vadd.f32 %v598_v38, %v530_v12  ;;  %v600_v44 = vpop.f32.mrf.mxu3  ;;  %v396_v45 = vpop.f32.mrf.mxu0  ;;  %v4074_v36 = vld [vmem:[#allocation2 + $0x148] sm:$0xff] }
 0x167   :  { %v1549_v48 = vrot.slane %v1357_v40, 2  ;;  %v1739_v0 = vmax.f32 %v1355_v51, %v1547_v6  ;;  %v864_v59 = vsel %vm728_vm2, %v646_v32, %v723_v29  ;;  %v865_v1 = vsel %vm730_vm3, %v646_v32, %v723_v29  ;;  %3089 = vmatpush.bf16.msra.mxu3 %v4075_v10  ;;  %3102 = vmatpush.bf16.msra.mxu0 %v4083_v11 }
 0x168   :  { %v1550_v21 = vrot.slane %v1358_v35, 2  ;;  %v1740_v2 = vmax.f32 %v1356_v39, %v1548_v33  ;;  %v866_v22 = vrot.slane %v865_v1, 2  ;;  %v867_v18 = vsel %vm733_vm4, %v646_v32, %v723_v29  ;;  %3115 = vmatpush.bf16.msra.mxu2 %v4091_v20  ;;  %v4066_v39 = vld [vmem:[#allocation2 + $0x108] sm:$0xff] }
 0x169   :  { %v1741_v8 = vmax.f32 %v1357_v40, %v1549_v48  ;;  %v1931_v61 = vperm.slane %v1739_v0, 0  ;;  %v868_v3 = vrot.slane %v867_v18, 4  ;;  %v869_v27 = vsel %vm325_vm0, %v723_v29, %v646_v32  ;;  %v4082_v40 = vld [vmem:[#allocation2 + $0x188] sm:$0xff]  ;;  %3077 = vmatpush.bf16.msra.mxu1 %v4066_v39 }
 0x16a   :  { %v1742_v37 = vmax.f32 %v1358_v35, %v1550_v21  ;;  %v1932_v42 = vperm.slane %v1740_v2, 0  ;;  %v870_v19 = vrot.slane %v869_v27, 6  ;;  %v3555_v50 = vrot.slane %v864_v59, 9 }
 0x16b   :  { %v1933_v55 = vperm.slane %v1741_v8, 0  ;;  %v3556_v23 = vrot.slane %v866_v22, 9  ;;  %v3557_v28 = vrot.slane %v868_v3, 9  ;;  %v649_v54 = vmax.f32 %v599_v24, 0.0  ;;  %3090 = vmatpush.bf16.msra.mxu3 %v4074_v36  ;;  %3103 = vmatpush.bf16.msra.mxu0 %v4082_v40 }
 0x16c   :  { %v1934_v30 = vperm.slane %v1742_v37, 0  ;;  %v2025_v16 = vsel %vm1955_vm5, %v1932_v42, %v1931_v61  ;;  %v3558_v31 = vrot.slane %v870_v19, 9  ;;  %v1359_v53 = vmax.f32 %v864_v59, %v3555_v50  ;;  %v534_v21 = vpop.f32.mrf.mxu2  ;;  %3116 = vmatpush.bf16.msra.mxu2 %v4090_v49  ;;  %v465_v37 = vpop.f32.mrf.mxu1 }
 0x16d   :  { %v2026_v32 = vsel %vm1957_vm6, %v1933_v55, %v2025_v16  ;;  %v1360_v57 = vmax.f32 %v866_v22, %v3556_v23  ;;  %v1361_v51 = vmax.f32 %v868_v3, %v3557_v28  ;;  %v4849_v38 = vsel %vm1967_vm11, %v1930_v47, %v4833_v56 }
 0x16e   :  { %v2027_v6 = vsel %vm1959_vm7, %v1934_v30, %v2026_v32  ;;  %v1362_v29 = vmax.f32 %v870_v19, %v3558_v31  ;;  %v1551_v12 = vrot.slane %v1359_v53, 2  ;;  %v724_v35 = vrot.slane %v649_v54, 6  ;;  %v603_v31 = vpop.f32.mrf.mxu3 }
 0x16f   :  { %v1552_v17 = vrot.slane %v1360_v57, 2  ;;  %v1553_v25 = vrot.slane %v1361_v51, 2  ;;  %v463_v33 = vadd.f32 %v462_v13, %v394_v62  ;;  %v532_v0 = vadd.f32 %v531_v26, %v4497_v60 }
 0x170   :  { %v1554_v63 = vrot.slane %v1362_v29, 2  ;;  %v1743_v48 = vmax.f32 %v1359_v53, %v1551_v12  ;;  %v397_v59 = vadd.f32 %v396_v45, %v4493_v52  ;;  %v871_v56 = vsel %vm728_vm2, %v4836_v58, %v724_v35  ;;  %v398_v53 = vpop.f32.mrf.mxu0 }
 0x171   :  { %v1744_v5 = vmax.f32 %v1360_v57, %v1552_v17  ;;  %v1745_v47 = vmax.f32 %v1361_v51, %v1553_v25  ;;  %v872_v1 = vsel %vm730_vm3, %v4836_v58, %v724_v35  ;;  %v874_v26 = vsel %vm733_vm4, %v4836_v58, %v724_v35 }
 0x172   :  { %v1746_v62 = vmax.f32 %v1362_v29, %v1554_v63  ;;  %v1935_v2 = vperm.slane %v1743_v48, 0  ;;  %v873_v22 = vrot.slane %v872_v1, 2  ;;  %v875_v61 = vrot.slane %v874_v26, 4 }
 0x173   :  { %v1936_v18 = vperm.slane %v1744_v5, 0  ;;  %v1937_v8 = vperm.slane %v1745_v47, 0  ;;  %v876_v3 = vsel %vm325_vm0, %v724_v35, %v4836_v58  ;;  %v3559_v11 = vrot.slane %v871_v56, 9 }
 0x174   :  { %v1938_v27 = vperm.slane %v1746_v62, 0  ;;  %v2028_v9 = vsel %vm1961_vm8, %v1935_v2, %v2027_v6  ;;  %v877_v10 = vrot.slane %v876_v3, 6  ;;  %v3560_v19 = vrot.slane %v873_v22, 9  ;;  %v467_v2 = vpop.f32.mrf.mxu1 }
 0x175   :  { %v2029_v42 = vsel %vm1963_vm9, %v1936_v18, %v2028_v9  ;;  %v3561_v50 = vrot.slane %v875_v61, 9  ;;  %v601_v13 = vadd.f32 %v600_v44, %v532_v0  ;;  %v1363_v23 = vmax.f32 %v871_v56, %v3559_v11 }
 0x176   :  { %v2030_v20 = vsel %vm1965_vm10, %v1937_v8, %v2029_v42  ;;  %v3562_v55 = vrot.slane %v877_v10, 9  ;;  %v466_v28 = vadd.f32 %v465_v37, %v397_v59  ;;  %v1364_v24 = vmax.f32 %v873_v22, %v3560_v19  ;;  %v605_v19 = vpop.f32.mrf.mxu3 }
 0x177   :  { %v1365_v30 = vmax.f32 %v875_v61, %v3561_v50  ;;  %v650_v16 = vmax.f32 %v463_v33, 0.0  ;;  %v651_v58 = vmax.f32 %v601_v13, 0.0  ;;  %v4866_v32 = vsel %vm1967_vm11, %v1938_v27, %v2030_v20  ;;  %v536_v33 = vpop.f32.mrf.mxu2 }
 0x178   :  { %v1366_v57 = vmax.f32 %v877_v10, %v3562_v55  ;;  %v1555_v51 = vrot.slane %v1363_v23, 2  ;;  %v535_v54 = vadd.f32 %v534_v21, %v4497_v60  ;;  %v1556_v45 = vrot.slane %v1364_v24, 2 }
 0x179   :  { %v1557_v44 = vrot.slane %v1365_v30, 2  ;;  %v725_v39 = vrot.slane %v651_v58, 6  ;;  %v652_v36 = vmax.f32 %v466_v28, 0.0  ;;  %v399_v12 = vadd.f32 %v398_v53, %v4493_v52 }
 0x17a   :  { %v1558_v40 = vrot.slane %v1366_v57, 2  ;;  %v1747_v6 = vmax.f32 %v1363_v23, %v1555_v51  ;;  %v604_v29 = vadd.f32 %v603_v31, %v535_v54  ;;  %v1748_v49 = vmax.f32 %v1364_v24, %v1556_v45 }
 0x17b   :  { %v1749_v17 = vmax.f32 %v1365_v30, %v1557_v44  ;;  %v878_v25 = vsel %vm728_vm2, %v650_v16, %v725_v39  ;;  %v879_v35 = vsel %vm730_vm3, %v650_v16, %v725_v39  ;;  %v881_v59 = vsel %vm733_vm4, %v650_v16, %v725_v39 }
 0x17c   :  { %v1750_v63 = vmax.f32 %v1366_v57, %v1558_v40  ;;  %v1939_v48 = vperm.slane %v1747_v6, 0  ;;  %v880_v0 = vrot.slane %v879_v35, 2  ;;  %v1940_v5 = vperm.slane %v1748_v49, 0 }
 0x17d   :  { %v1941_v47 = vperm.slane %v1749_v17, 0  ;;  %v882_v56 = vrot.slane %v881_v59, 4  ;;  %v883_v1 = vsel %vm325_vm0, %v725_v39, %v650_v16  ;;  %v3563_v62 = vrot.slane %v878_v25, 9 }
 0x17e   :  { %v884_v21 = vrot.slane %v883_v1, 6  ;;  %v3564_v52 = vrot.slane %v880_v0, 9  ;;  %v537_v22 = vadd.f32 %v536_v33, %v4497_v60  ;;  %v1942_v26 = vperm.slane %v1750_v63, 0 }
 0x17f   :  { %v2032_v18 = vsel %vm1955_vm5, %v1940_v5, %v1939_v48  ;;  %v3565_v8 = vrot.slane %v882_v56, 9  ;;  %v653_v61 = vmax.f32 %v604_v29, 0.0  ;;  %v1367_v9 = vmax.f32 %v878_v25, %v3563_v62 }
 0x180   :  { %v2033_v3 = vsel %vm1957_vm6, %v1941_v47, %v2032_v18  ;;  %v3566_v27 = vrot.slane %v884_v21, 9  ;;  %v1368_v10 = vmax.f32 %v880_v0, %v3564_v52  ;;  %v468_v50 = vadd.f32 %v467_v2, %v399_v12 }
 0x181   :  { %v2034_v11 = vsel %vm1959_vm7, %v1942_v26, %v2033_v3  ;;  %v1369_v37 = vmax.f32 %v882_v56, %v3565_v8  ;;  %v726_v42 = vrot.slane %v653_v61, 6  ;;  %v1559_v20 = vrot.slane %v1367_v9, 2  ;;  %v4065_v61 = vld [vmem:[#allocation2 + $0x100] sm:$0xff] }
 0x182   :  { %v1370_v13 = vmax.f32 %v884_v21, %v3566_v27  ;;  %v1560_v55 = vrot.slane %v1368_v10, 2  ;;  %v606_v60 = vadd.f32 %v605_v19, %v537_v22  ;;  %v654_v33 = vmax.f32 %v468_v50, 0.0  ;;  %v4073_v3 = vld [vmem:[#allocation2 + $0x140] sm:$0xff]  ;;  %3078 = vmatpush.bf16.msra.mxu1 %v4065_v61 }
 0x183   :  { %v1561_v23 = vrot.slane %v1369_v37, 2  ;;  %v885_v28 = vsel %vm728_vm2, %v652_v36, %v726_v42  ;;  %v886_v24 = vsel %vm730_vm3, %v652_v36, %v726_v42  ;;  %v888_v30 = vsel %vm733_vm4, %v652_v36, %v726_v42  ;;  %v4081_v27 = vld [vmem:[#allocation2 + $0x180] sm:$0xff]  ;;  %3091 = vmatpush.bf16.msra.mxu3 %v4073_v3 }
 0x184   :  { %v1562_v16 = vrot.slane %v1370_v13, 2  ;;  %v1751_v58 = vmax.f32 %v1367_v9, %v1559_v20  ;;  %v1752_v31 = vmax.f32 %v1368_v10, %v1560_v55  ;;  %v887_v53 = vrot.slane %v886_v24, 2  ;;  %3104 = vmatpush.bf16.msra.mxu0 %v4081_v27 }
 0x185   :  { %v1753_v57 = vmax.f32 %v1369_v37, %v1561_v23  ;;  %v889_v51 = vrot.slane %v888_v30, 4  ;;  %v890_v54 = vsel %vm325_vm0, %v726_v42, %v652_v36  ;;  %v3567_v45 = vrot.slane %v885_v28, 9  ;;  %v4089_v42 = vld [vmem:[#allocation2 + $0x1c0] sm:$0xff] }
 0x186   :  { %v1754_v44 = vmax.f32 %v1370_v13, %v1562_v16  ;;  %v1943_v39 = vperm.slane %v1751_v58, 0  ;;  %v1944_v40 = vperm.slane %v1752_v31, 0  ;;  %v891_v6 = vrot.slane %v890_v54, 6  ;;  %3117 = vmatpush.bf16.msra.mxu2 %v4089_v42 }
 0x187   :  { %v1945_v29 = vperm.slane %v1753_v57, 0  ;;  %v3568_v12 = vrot.slane %v887_v53, 9  ;;  %v3569_v49 = vrot.slane %v889_v51, 9  ;;  %v1371_v17 = vmax.f32 %v885_v28, %v3567_v45 }
 0x188   :  { %v2035_v25 = vsel %vm1961_vm8, %v1943_v39, %v2034_v11  ;;  %v3570_v35 = vrot.slane %v891_v6, 9  ;;  %v655_v63 = vmax.f32 %v606_v60, 0.0  ;;  %v1946_v36 = vperm.slane %v1754_v44, 0 }
 0x189   :  { %v2036_v48 = vsel %vm1963_vm9, %v1944_v40, %v2035_v25  ;;  %v1372_v0 = vmax.f32 %v887_v53, %v3568_v12  ;;  %v1373_v59 = vmax.f32 %v889_v51, %v3569_v49  ;;  %v1563_v5 = vrot.slane %v1371_v17, 2 }
 0x18a   :  { %v2037_v47 = vsel %vm1965_vm10, %v1945_v29, %v2036_v48  ;;  %v1374_v56 = vmax.f32 %v891_v6, %v3570_v35  ;;  %v727_v1 = vrot.slane %v655_v63, 6  ;;  %v2104_v2 = vrot.slane %v4574_v14, 3 }
 0x18b   :  { %v1564_v21 = vrot.slane %v1372_v0, 2  ;;  %v1565_v62 = vrot.slane %v1373_v59, 2  ;;  %v1755_v52 = vmax.f32 %v1371_v17, %v1563_v5  ;;  %v4891_v58 = vsel %vm1967_vm11, %v1946_v36, %v2037_v47 }
 0x18c   :  { %v1566_v22 = vrot.slane %v1374_v56, 2  ;;  %v892_v26 = vsel %vm728_vm2, %v654_v33, %v727_v1  ;;  %v893_v18 = vsel %vm730_vm3, %v654_v33, %v727_v1  ;;  %v895_v8 = vsel %vm733_vm4, %v654_v33, %v727_v1 }
 0x18d   :  { %v1756_v9 = vmax.f32 %v1372_v0, %v1564_v21  ;;  %v1757_v10 = vmax.f32 %v1373_v59, %v1565_v62  ;;  %v1947_v11 = vperm.slane %v1755_v52, 0  ;;  %v894_v37 = vrot.slane %v893_v18, 2 }
 0x18e   :  { %v1758_v19 = vmax.f32 %v1374_v56, %v1566_v22  ;;  %v896_v50 = vrot.slane %v895_v8, 4  ;;  %v897_v13 = vsel %vm325_vm0, %v727_v1, %v654_v33  ;;  %v3571_v20 = vrot.slane %v892_v26, 9 }
 0x18f   :  { %v1948_v55 = vperm.slane %v1756_v9, 0  ;;  %v1949_v60 = vperm.slane %v1757_v10, 0  ;;  %v898_v23 = vrot.slane %v897_v13, 6  ;;  %v3572_v28 = vrot.slane %v894_v37, 9 }
 0x190   :  { %v1950_v24 = vperm.slane %v1758_v19, 0  ;;  %v3573_v30 = vrot.slane %v896_v50, 9  ;;  %v1375_v16 = vmax.f32 %v892_v26, %v3571_v20  ;;  %v2106_v51 = vrot.slane %v4610_v43, 6 }
 0x191   :  { %v2039_v31 = vsel %vm1955_vm5, %v1948_v55, %v1947_v11  ;;  %v3574_v53 = vrot.slane %v898_v23, 9  ;;  %v1376_v57 = vmax.f32 %v894_v37, %v3572_v28  ;;  %v2105_v44 = vsel %vm2058_vm12, %v2104_v2, 0.0  ;;  %v4128_v37 = vld [vmem:[#allocation2 + $0x2f8] sm:$0xff] }
 0x192   :  { %v1377_v54 = vmax.f32 %v896_v50, %v3573_v30  ;;  %v1567_v45 = vrot.slane %v1375_v16, 2  ;;  %v2108_v39 = vrot.slane %v4673_v34, 1  ;;  %v2040_v40 = vsel %vm1957_vm6, %v1949_v60, %v2039_v31 }
 0x193   :  { %v1378_v6 = vmax.f32 %v898_v23, %v3574_v53  ;;  %v1568_v29 = vrot.slane %v1376_v57, 2  ;;  %v2107_v12 = vsel %vm1955_vm5, %v2106_v51, %v2105_v44  ;;  %v2110_v35 = vrot.slane %v4705_v4, 4 }
 0x194   :  { %v1569_v49 = vrot.slane %v1377_v54, 2  ;;  %v1759_v17 = vmax.f32 %v1375_v16, %v1567_v45  ;;  %v2109_v25 = vsel %vm1957_vm6, %v2108_v39, %v2107_v12  ;;  %v2112_v48 = vrot.slane %v4774_v15, 7 }
 0x195   :  { %v1570_v33 = vrot.slane %v1378_v6, 2  ;;  %v1760_v63 = vmax.f32 %v1376_v57, %v1568_v29  ;;  %v2114_v0 = vrot.slane %v4814_v41, 2  ;;  %v2111_v36 = vsel %vm1959_vm7, %v2110_v35, %v2109_v25 }
 0x196   :  { %v1761_v59 = vmax.f32 %v1377_v54, %v1569_v49  ;;  %v1951_v5 = vperm.slane %v1759_v17, 0  ;;  %v2116_v47 = vrot.slane %v4866_v32, 5  ;;  %v2041_v56 = vsel %vm1959_vm7, %v1950_v24, %v2040_v40  ;;  %v4127_v54 = vld [vmem:[#allocation2 + $0x2f0] sm:$0xff]  ;;  %v4104_v17 = vld [vmem:[#allocation2 + $0x238] sm:$0xff] }
 0x197   :  { %v1762_v1 = vmax.f32 %v1378_v6, %v1570_v33  ;;  %v1952_v21 = vperm.slane %v1760_v63, 0  ;;  %v2113_v62 = vsel %vm1961_vm8, %v2112_v48, %v2111_v36  ;;  %v2060_v26 = vrot.slane %v4610_v43, 3  ;;  %v4126_v36 = vld [vmem:[#allocation2 + $0x2e8] sm:$0xff] }
 0x198   :  { %v1953_v52 = vperm.slane %v1761_v59, 0  ;;  %v2042_v2 = vsel %vm1961_vm8, %v1951_v5, %v2041_v56  ;;  %v2115_v22 = vsel %vm1963_vm9, %v2114_v0, %v2113_v62  ;;  %v2059_v61 = vsel %vm2058_vm12, %v4574_v14, 0.0 }
 0x199   :  { %v2043_v18 = vsel %vm1963_vm9, %v1952_v21, %v2042_v2  ;;  %v2117_v8 = vsel %vm1965_vm10, %v2116_v47, %v2115_v22  ;;  %v2062_v3 = vrot.slane %v4673_v34, 6  ;;  %v2061_v10 = vsel %vm1955_vm5, %v2060_v26, %v2059_v61  ;;  %v4103_v2 = vld [vmem:[#allocation2 + $0x230] sm:$0xff] }
 0x19a   :  { %v2044_v27 = vsel %vm1965_vm10, %v1953_v52, %v2043_v18  ;;  %v2118_v9 = vsel %vm1967_vm11, %v4891_v58, %v2117_v8  ;;  %v2064_v11 = vrot.slane %v4705_v4, 1  ;;  %v1954_v42 = vperm.slane %v1762_v1, 0 }
 0x19b   :  { %v2238_v19 = vpack.c.bf16 %v2118_v9, %v2118_v9  ;;  %v2063_v50 = vsel %vm1957_vm6, %v2062_v3, %v2061_v10  ;;  %v2066_v13 = vrot.slane %v4774_v15, 4  ;;  %v2068_v55 = vrot.slane %v4814_v41, 7 }
 0x19c   :  { %v2065_v20 = vsel %vm1959_vm7, %v2064_v11, %v2063_v50  ;;  %v2070_v60 = vrot.slane %v4866_v32, 2  ;;  %v2072_v23 = vrot.slane %v4891_v58, 5  ;;  %v4931_v28 = vsel %vm1967_vm11, %v1954_v42, %v2044_v27  ;;  %v4125_v42 = vld [vmem:[#allocation2 + $0x2e0] sm:$0xff] }
 0x19d   :  { %3066 = vmatmul.bf16.vlgmr.msrb.gmra.mxu2 %v2238_v19  ;;  %v2067_v24 = vsel %vm1961_vm8, %v2066_v13, %v2065_v20  ;;  %v2074_v30 = vrot.slane %v4574_v14, 1  ;;  %v2076_v16 = vrot.slane %v4610_v43, 4  ;;  %v2078_v53 = vrot.slane %v4673_v34, 7 }
 0x19e   :  { %v2069_v31 = vsel %vm1963_vm9, %v2068_v55, %v2067_v24  ;;  %v2080_v57 = vrot.slane %v4705_v4, 2  ;;  %v2082_v51 = vrot.slane %v4774_v15, 5  ;;  %3162 = vmatpush.bf16.msrb.mxu2 %v4128_v37  ;;  %v2085_v39 = vrot.slane %v4866_v32, 3  ;;  %v4112_v37 = vld [vmem:[#allocation2 + $0x278] sm:$0xff] }
 0x19f   :  { %v2071_v45 = vsel %vm1965_vm10, %v2070_v60, %v2069_v31  ;;  %v2075_v44 = vsel %vm2058_vm12, %v2074_v30, 0.0  ;;  %v2087_v40 = vrot.slane %v4891_v58, 6  ;;  %v2089_v12 = vrot.slane %v4574_v14, 2 }
 0x1a0   :  { %v2073_v6 = vsel %vm1967_vm11, %v2072_v23, %v2071_v45  ;;  %v2077_v29 = vsel %vm1955_vm5, %v2076_v16, %v2075_v44  ;;  %v2091_v49 = vrot.slane %v4610_v43, 5  ;;  %v2094_v33 = vrot.slane %v4705_v4, 3  ;;  %v4102_v16 = vld [vmem:[#allocation2 + $0x228] sm:$0xff] }
 0x1a1   :  { %v2235_v25 = vpack.c.bf16 %v2073_v6, %v2073_v6  ;;  %v2079_v35 = vsel %vm1957_vm6, %v2078_v53, %v2077_v29  ;;  %v2096_v63 = vrot.slane %v4774_v15, 6  ;;  %v2090_v0 = vsel %vm2058_vm12, %v2089_v12, 0.0  ;;  %v4111_v6 = vld [vmem:[#allocation2 + $0x270] sm:$0xff] }
 0x1a2   :  { %v2081_v48 = vsel %vm1959_vm7, %v2080_v57, %v2079_v35  ;;  %v2098_v59 = vrot.slane %v4814_v41, 1  ;;  %v2100_v5 = vrot.slane %v4866_v32, 4  ;;  %3163 = vmatpush.bf16.msrb.mxu2 %v4127_v54  ;;  %v2092_v56 = vsel %vm1955_vm5, %v2091_v49, %v2090_v0  ;;  %v4120_v54 = vld [vmem:[#allocation2 + $0x2b8] sm:$0xff] }
 0x1a3   :  { %3027 = vmatmul.bf16.vlgmr.msrb.gmra.mxu1 %v2235_v25  ;;  %v2083_v47 = vsel %vm1961_vm8, %v2082_v51, %v2081_v48  ;;  %v2102_v1 = vrot.slane %v4891_v58, 7  ;;  %v2119_v21 = vrot.slane %v4574_v14, 4  ;;  %v2093_v52 = vsel %vm1957_vm6, %v4673_v34, %v2092_v56  ;;  %v4101_v48 = vld [vmem:[#allocation2 + $0x220] sm:$0xff] }
 0x1a4   :  { %v2084_v62 = vsel %vm1963_vm9, %v4814_v41, %v2083_v47  ;;  %3123 = vmatpush.bf16.msrb.mxu1 %v4104_v17  ;;  %v2121_v22 = vrot.slane %v4638_v7, 7  ;;  %v2123_v18 = vrot.slane %v4673_v34, 2  ;;  %v2095_v61 = vsel %vm1959_vm7, %v2094_v33, %v2093_v52  ;;  %v4124_v17 = vld [vmem:[#allocation2 + $0x2d8] sm:$0xff]  ;;  %v4119_v47 = vld [vmem:[#allocation2 + $0x2b0] sm:$0xff]  ;;  %v4110_v52 = vld [vmem:[#allocation2 + $0x268] sm:$0xff] }
 0x1a5   :  { %v2086_v8 = vsel %vm1965_vm10, %v2085_v39, %v2084_v62  ;;  %v2120_v3 = vsel %vm2058_vm12, %v2119_v21, 0.0  ;;  %v2125_v27 = vrot.slane %v4746_v46, 5  ;;  %v2097_v10 = vsel %vm1961_vm8, %v2096_v63, %v2095_v61  ;;  %v4123_v61 = vld [vmem:[#allocation2 + $0x2d0] sm:$0xff] }
 0x1a6   :  { %v2088_v9 = vsel %vm1967_vm11, %v2087_v40, %v2086_v8  ;;  %3164 = vmatpush.bf16.msrb.mxu2 %v4126_v36  ;;  %v2122_v19 = vsel %vm1955_vm5, %v2121_v22, %v2120_v3  ;;  %v2128_v50 = vrot.slane %v4849_v38, 3  ;;  %v2099_v20 = vsel %vm1963_vm9, %v2098_v59, %v2097_v10 }
 0x1a7   :  { %v2236_v13 = vpack.c.bf16 %v2088_v9, %v2088_v9  ;;  %v2124_v60 = vsel %vm1957_vm6, %v2123_v18, %v2122_v19  ;;  %v2130_v24 = vrot.slane %v4866_v32, 6  ;;  %v2101_v30 = vsel %vm1965_vm10, %v2100_v5, %v2099_v20  ;;  %v4118_v20 = vld [vmem:[#allocation2 + $0x2a8] sm:$0xff] }
 0x1a8   :  { %3124 = vmatpush.bf16.msrb.mxu1 %v4103_v2  ;;  %v2126_v31 = vsel %vm1959_vm7, %v2125_v27, %v2124_v60  ;;  %v2132_v53 = vrot.slane %v4931_v28, 1  ;;  %v2134_v57 = vrot.slane %v4574_v14, 5  ;;  %v2103_v51 = vsel %vm1967_vm11, %v2102_v1, %v2101_v30 }
 0x1a9   :  { %3040 = vmatmul.bf16.vlgmr.msrb.gmra.mxu3 %v2236_v13  ;;  %v2127_v45 = vsel %vm1961_vm8, %v4774_v15, %v2126_v31  ;;  %v2137_v44 = vrot.slane %v4673_v34, 3  ;;  %v2139_v39 = vrot.slane %v4746_v46, 6  ;;  %v2237_v40 = vpack.c.bf16 %v2103_v51, %v2103_v51  ;;  %v4100_v13 = vld [vmem:[#allocation2 + $0x218] sm:$0xff]  ;;  %v4109_v31 = vld [vmem:[#allocation2 + $0x260] sm:$0xff] }
 0x1aa   :  { %3136 = vmatpush.bf16.msrb.mxu3 %v4112_v37  ;;  %3165 = vmatpush.bf16.msrb.mxu2 %v4125_v42  ;;  %v2129_v29 = vsel %vm1963_vm9, %v2128_v50, %v2127_v45  ;;  %v2135_v12 = vsel %vm2058_vm12, %v2134_v57, 0.0  ;;  %v2141_v49 = vrot.slane %v4774_v15, 1  ;;  %v2143_v33 = vrot.slane %v4849_v38, 4 }
 0x1ab   :  { %v2131_v25 = vsel %vm1965_vm10, %v2130_v24, %v2129_v29  ;;  %v2136_v35 = vsel %vm1955_vm5, %v4638_v7, %v2135_v12  ;;  %v2145_v63 = vrot.slane %v4866_v32, 7  ;;  %3053 = vmatmul.bf16.vlgmr.msrb.gmra.mxu0 %v2237_v40  ;;  %v2147_v5 = vrot.slane %v4931_v28, 2 }
 0x1ac   :  { %3125 = vmatpush.bf16.msrb.mxu1 %v4102_v16  ;;  %v2133_v0 = vsel %vm1967_vm11, %v2132_v53, %v2131_v25  ;;  %v2138_v59 = vsel %vm1957_vm6, %v2137_v44, %v2136_v35  ;;  %v2149_v36 = vrot.slane %v4574_v14, 6  ;;  %3149 = vmatpush.bf16.msrb.mxu0 %v4120_v54  ;;  %v2151_v21 = vrot.slane %v4638_v7, 1  ;;  %v4122_v54 = vld [vmem:[#allocation2 + $0x2c8] sm:$0xff] }
 0x1ad   :  { %v2239_v56 = vpack.c.bf16 %v2133_v0, %v2133_v0  ;;  %v2140_v1 = vsel %vm1959_vm7, %v2139_v39, %v2138_v59  ;;  %v2153_v62 = vrot.slane %v4673_v34, 4  ;;  %v2155_v18 = vrot.slane %v4746_v46, 7 }
 0x1ae   :  { %3137 = vmatpush.bf16.msrb.mxu3 %v4111_v6  ;;  %v2142_v2 = vsel %vm1961_vm8, %v2141_v49, %v2140_v1  ;;  %v2150_v22 = vsel %vm2058_vm12, %v2149_v36, 0.0  ;;  %v2157_v8 = vrot.slane %v4774_v15, 2  ;;  %3166 = vmatpush.bf16.msrb.mxu2 %v4124_v17  ;;  %v2159_v9 = vrot.slane %v4849_v38, 5  ;;  %v4099_v6 = vld [vmem:[#allocation2 + $0x210] sm:$0xff]  ;;  %v4117_v49 = vld [vmem:[#allocation2 + $0x2a0] sm:$0xff] }
 0x1af   :  { %v2144_v3 = vsel %vm1963_vm9, %v2143_v33, %v2142_v2  ;;  %v2152_v27 = vsel %vm1955_vm5, %v2151_v21, %v2150_v22  ;;  %v2162_v10 = vrot.slane %v4931_v28, 3  ;;  %v2164_v19 = vrot.slane %v4574_v14, 7  ;;  %v4116_v22 = vld [vmem:[#allocation2 + $0x298] sm:$0xff] }
 0x1b0   :  { %3126 = vmatpush.bf16.msrb.mxu1 %v4101_v48  ;;  %v2146_v37 = vsel %vm1965_vm10, %v2145_v63, %v2144_v3  ;;  %v2154_v42 = vsel %vm1957_vm6, %v2153_v62, %v2152_v27  ;;  %v2166_v50 = vrot.slane %v4638_v7, 2  ;;  %3150 = vmatpush.bf16.msrb.mxu0 %v4119_v47  ;;  %v2168_v30 = vrot.slane %v4673_v34, 5  ;;  %v4108_v63 = vld [vmem:[#allocation2 + $0x258] sm:$0xff]  ;;  %v4121_v48 = vld [vmem:[#allocation2 + $0x2c0] sm:$0xff] }
 0x1b1   :  { %v2148_v60 = vsel %vm1967_vm11, %v2147_v5, %v2146_v37  ;;  %v2156_v24 = vsel %vm1959_vm7, %v2155_v18, %v2154_v42  ;;  %v2171_v16 = vrot.slane %v4774_v15, 3  ;;  %v2165_v14 = vsel %vm2058_vm12, %v2164_v19, 0.0  ;;  %v4098_v18 = vld [vmem:[#allocation2 + $0x208] sm:$0xff] }
 0x1b2   :  { %3138 = vmatpush.bf16.msrb.mxu3 %v4110_v52  ;;  %v2240_v53 = vpack.c.bf16 %v2148_v60, %v2148_v60  ;;  %v2158_v57 = vsel %vm1961_vm8, %v2157_v8, %v2156_v24  ;;  %v2173_v51 = vrot.slane %v4849_v38, 6  ;;  %3167 = vmatpush.bf16.msrb.mxu2 %v4123_v61  ;;  %v2167_v44 = vsel %vm1955_vm5, %v2166_v50, %v2165_v14  ;;  %v4115_v24 = vld [vmem:[#allocation2 + $0x290] sm:$0xff]  ;;  %v4106_v14 = vld [vmem:[#allocation2 + $0x248] sm:$0xff] }
 0x1b3   :  { %3079 = vmatmul.bf16.vlgmr.msra.gmra.mxu1 %v2239_v56  ;;  %v2160_v45 = vsel %vm1963_vm9, %v2159_v9, %v2158_v57  ;;  %v2175_v34 = vrot.slane %v4866_v32, 1  ;;  %v2177_v15 = vrot.slane %v4931_v28, 4  ;;  %v2169_v40 = vsel %vm1957_vm6, %v2168_v30, %v2167_v44  ;;  %v4107_v9 = vld [vmem:[#allocation2 + $0x250] sm:$0xff]  ;;  %v4097_v30 = vld [vmem:[#allocation2 + $0x200] sm:$0xff] }
 0x1b4   :  { %v2161_v39 = vsel %vm1965_vm10, %v4866_v32, %v2160_v45  ;;  %3127 = vmatpush.bf16.msrb.mxu1 %v4100_v13  ;;  %v2179_v29 = vsel %vm2058_vm12, %v4610_v43, 0.0  ;;  %v2180_v12 = vrot.slane %v4638_v7, 3  ;;  %3151 = vmatpush.bf16.msrb.mxu0 %v4118_v20  ;;  %v2170_v25 = vsel %vm1959_vm7, %v4746_v46, %v2169_v40 }
 0x1b5   :  { %v2163_v17 = vsel %vm1967_vm11, %v2162_v10, %v2161_v39  ;;  %v2182_v35 = vrot.slane %v4705_v4, 6  ;;  %v2184_v32 = vrot.slane %v4746_v46, 1  ;;  %v2172_v33 = vsel %vm1961_vm8, %v2171_v16, %v2170_v25  ;;  %v4105_v25 = vld [vmem:[#allocation2 + $0x240] sm:$0xff] }
 0x1b6   :  { %3139 = vmatpush.bf16.msrb.mxu3 %v4109_v31  ;;  %3168 = vmatpush.bf16.msrb.mxu2 %v4122_v54  ;;  %v2181_v0 = vsel %vm1955_vm5, %v2180_v12, %v2179_v29  ;;  %v2186_v59 = vrot.slane %v4814_v41, 4  ;;  %v2241_v5 = vpack.c.bf16 %v2163_v17, %v2163_v17  ;;  %v2174_v36 = vsel %vm1963_vm9, %v2173_v51, %v2172_v33  ;;  %v4114_v12 = vld [vmem:[#allocation2 + $0x288] sm:$0xff] }
 0x1b7   :  { %v2183_v47 = vsel %vm1957_vm6, %v2182_v35, %v2181_v0  ;;  %v2188_v56 = vrot.slane %v4849_v38, 7  ;;  %v2176_v1 = vsel %vm1965_vm10, %v2175_v34, %v2174_v36  ;;  %v2190_v62 = vrot.slane %v4891_v58, 2  ;;  %v4113_v36 = vld [vmem:[#allocation2 + $0x280] sm:$0xff] }
 0x1b8   :  { %3128 = vmatpush.bf16.msrb.mxu1 %v4099_v6  ;;  %v2185_v21 = vsel %vm1959_vm7, %v2184_v32, %v2183_v47  ;;  %v2194_v52 = vrot.slane %v4610_v43, 1  ;;  %3152 = vmatpush.bf16.msrb.mxu0 %v4117_v49  ;;  %v2178_v2 = vsel %vm1967_vm11, %v2177_v15, %v2176_v1  ;;  %v2192_v8 = vrot.slane %v4931_v28, 5 }
 0x1b9   :  { %3092 = vmatmul.bf16.vlgmr.msra.gmra.mxu3 %v2240_v53  ;;  %v2196_v61 = vrot.slane %v4638_v7, 4  ;;  %v2198_v3 = vrot.slane %v4705_v4, 7  ;;  %v2242_v27 = vpack.c.bf16 %v2178_v2, %v2178_v2  ;;  %v2187_v10 = vsel %vm1961_vm8, %v2186_v59, %v2185_v21 }
 0x1ba   :  { %3140 = vmatpush.bf16.msrb.mxu3 %v4108_v63  ;;  %3169 = vmatpush.bf16.msrb.mxu2 %v4121_v48  ;;  %v2195_v37 = vsel %vm2058_vm12, %v2194_v52, 0.0  ;;  %v2200_v42 = vrot.slane %v4746_v46, 2  ;;  %v2189_v19 = vsel %vm1963_vm9, %v2188_v56, %v2187_v10  ;;  %v2209_v60 = vrot.slane %v4610_v43, 2 }
 0x1bb   :  { %v2197_v50 = vsel %vm1955_vm5, %v2196_v61, %v2195_v37  ;;  %3105 = vmatmul.bf16.vlgmr.msra.gmra.mxu0 %v2241_v5  ;;  %3118 = vmatmul.bf16.vlgmr.msra.gmra.mxu2 %v2242_v27  ;;  %v2191_v13 = vsel %vm1965_vm10, %v2190_v62, %v2189_v19  ;;  %v2202_v31 = vrot.slane %v4814_v41, 5  ;;  %v2211_v53 = vrot.slane %v4638_v7, 5 }
 0x1bc   :  { %v2199_v20 = vsel %vm1957_vm6, %v2198_v3, %v2197_v50  ;;  %3153 = vmatpush.bf16.msrb.mxu0 %v4116_v22  ;;  %3129 = vmatpush.bf16.msrb.mxu1 %v4098_v18  ;;  %v2214_v57 = vrot.slane %v4746_v46, 3  ;;  %v2193_v51 = vsel %vm1967_vm11, %v2192_v8, %v2191_v13  ;;  %v2210_v54 = vsel %vm2058_vm12, %v2209_v60, 0.0  ;;  %v4132_v3 = vld [vmem:[%s5143_s5 + $0x18] sm:$0xff]  ;;  %v4131_v13 = vld [vmem:[%s5143_s5 + $0x10] sm:$0xff] }
 0x1bd   :  { %v2201_v16 = vsel %vm1959_vm7, %v2200_v42, %v2199_v20  ;;  %v2224_v45 = vsel %vm2058_vm12, %v2060_v26, 0.0  ;;  %v2205_v44 = vrot.slane %v4891_v58, 3  ;;  %v2207_v34 = vrot.slane %v4931_v28, 6  ;;  %v4130_v20 = vld [vmem:[%s5143_s5 + $0x8] sm:$0xff] }
 0x1be   :  { %3141 = vmatpush.bf16.msrb.mxu3 %v4107_v9  ;;  %v2212_v15 = vsel %vm1955_vm5, %v2211_v53, %v2210_v54  ;;  %v2216_v40 = vrot.slane %v4814_v41, 6  ;;  %v2225_v6 = vrot.slane %v4638_v7, 6  ;;  %v2228_v29 = vrot.slane %v4746_v46, 4  ;;  %v4141_v9 = vld [vmem:[%s5142_s4] ss:$0 sm:$0xff] }
 0x1bf   :  { %v2213_v39 = vsel %vm1957_vm6, %v4705_v4, %v2212_v15  ;;  %v2243_v43 = vpack.c.bf16 %v2193_v51, %v2193_v51  ;;  %v2203_v26 = vsel %vm1961_vm8, %v2202_v31, %v2201_v16  ;;  %v2218_v17 = vrot.slane %v4849_v38, 1  ;;  %v4129_v16 = vld [vmem:[%s5143_s5] sm:$0xff] }
 0x1c0   :  { %3154 = vmatpush.bf16.msrb.mxu0 %v4115_v24  ;;  %3130 = vmatpush.bf16.msrb.mxu1 %v4097_v30  ;;  %v2215_v49 = vsel %vm1959_vm7, %v2214_v57, %v2213_v39  ;;  %v2204_v35 = vsel %vm1963_vm9, %v4849_v38, %v2203_v26  ;;  %v2220_v32 = vrot.slane %v4891_v58, 4  ;;  %v2226_v7 = vsel %vm1955_vm5, %v2225_v6, %v2224_v45  ;;  %v4135_v58 = vld [vmem:[%s5143_s5 + $0x30] sm:$0xff] }
 0x1c1   :  { %v2231_v46 = vrot.slane %v4849_v38, 2  ;;  %v2206_v33 = vsel %vm1965_vm10, %v2205_v44, %v2204_v35  ;;  %v2222_v63 = vrot.slane %v4931_v28, 7  ;;  %v2227_v48 = vsel %vm1957_vm6, %v2064_v11, %v2226_v7 }
 0x1c2   :  { %3142 = vmatpush.bf16.msrb.mxu3 %v4106_v14  ;;  %v2208_v0 = vsel %vm1967_vm11, %v2207_v34, %v2206_v33  ;;  %v2217_v59 = vsel %vm1961_vm8, %v2216_v40, %v2215_v49  ;;  %v2229_v5 = vsel %vm1959_vm7, %v2228_v29, %v2227_v48  ;;  %v4142_v33 = vld [vmem:[%s5144_s6] ss:$0 sm:$0xff]  ;;  %s3277_s6 = sshll.u32 %s5145_s7, 4  ;;  %s3278_s6 = int_to_ptr.hbm [resolvable:$true] %s3277_s6 }
 0x1c3   :  { %3131 = vmatmul.bf16.vlgmr.msrb.gmra.mxu1 %v2243_v43  ;;  %v2219_v47 = vsel %vm1963_vm9, %v2218_v17, %v2217_v59  ;;  %v2230_v38 = vsel %vm1961_vm8, %v2068_v55, %v2229_v5  ;;  %v2244_v56 = vpack.c.bf16 %v2208_v0, %v2208_v0  ;;  %v4136_v55 = vld [vmem:[%s5143_s5 + $0x38] sm:$0xff] }
 0x1c4   :  { %3155 = vmatpush.bf16.msrb.mxu0 %v4114_v12  ;;  %v2221_v4 = vsel %vm1965_vm10, %v2220_v32, %v2219_v47  ;;  %v2232_v11 = vsel %vm1963_vm9, %v2231_v46, %v2230_v38  ;;  %3245 = vmatpush.bf16.msra.mxu1 %v4136_v55 }
 0x1c5   :  { %v2223_v1 = vsel %vm1967_vm11, %v2222_v63, %v2221_v4  ;;  %v2233_v21 = vsel %vm1965_vm10, %v2072_v23, %v2232_v11  ;;  %v4134_v23 = vld [vmem:[%s5143_s5 + $0x28] sm:$0xff] }
 0x1c6   :  { %3143 = vmatpush.bf16.msrb.mxu3 %v4105_v25  ;;  %v2234_v62 = vsel %vm1967_vm11, %v4931_v28, %v2233_v21  ;;  %v2245_v41 = vpack.c.bf16 %v2223_v1, %v2223_v1  ;;  %v4133_v28 = vld [vmem:[%s5143_s5 + $0x20] sm:$0xff] }
 0x1c7   :  { %v2246_v52 = vpack.c.bf16 %v2234_v62, %v2234_v62 }
 0x1c8   :  { %3156 = vmatpush.bf16.msrb.mxu0 %v4113_v36  ;;  %3246 = vmatpush.bf16.msra.mxu1 %v4135_v58 }
 0x1c9   :  { %3144 = vmatmul.bf16.vlgmr.msrb.gmra.mxu3 %v2244_v56 }
 0x1cb   :  { %3157 = vmatmul.bf16.vlgmr.msrb.gmra.mxu0 %v2245_v41  ;;  %3170 = vmatmul.bf16.vlgmr.msrb.gmra.mxu2 %v2246_v52 }
 0x1cc   :  { %3247 = vmatpush.bf16.msra.mxu1 %v4134_v23 }
 0x1d0   :  { %3248 = vmatpush.bf16.msra.mxu1 %v4133_v28 }
 0x1d4   :  { %3249 = vmatpush.bf16.msra.mxu1 %v4132_v3 }
 0x1d8   :  { %3250 = vmatpush.bf16.msra.mxu1 %v4131_v13 }
 0x1dc   :  { %3251 = vmatpush.bf16.msra.mxu1 %v4130_v20 }
 0x1e0   :  { %3252 = vmatpush.bf16.msra.mxu1 %v4129_v16 }
 0x220   :  { %v3028_v2 = vpop.f32.mrf.mxu1  ;;  %v3067_v22 = vpop.f32.mrf.mxu2 }
 0x221   :  { %v3029_v42 = vadd.f32 %v4141_v9, %v3028_v2 }
 0x228   :  { %v3030_v18 = vpop.f32.mrf.mxu1  ;;  %v3069_v8 = vpop.f32.mrf.mxu2 }
 0x229   :  { %v3054_v61 = vpop.f32.mrf.mxu0 }
 0x22c   :  { %v3041_v27 = vpop.f32.mrf.mxu3 }
 0x22d   :  { %v3042_v50 = vadd.f32 %v3041_v27, %v3029_v42 }
 0x22f   :  { %v3055_v24 = vadd.f32 %v3054_v61, %v3042_v50 }
 0x230   :  { %v3080_v10 = vpop.f32.mrf.mxu1 }
 0x231   :  { %v3056_v37 = vpop.f32.mrf.mxu0  ;;  %v3068_v53 = vadd.f32 %v3067_v22, %v3055_v24 }
 0x233   :  { %v3081_v57 = vadd.f32 %v3080_v10, %v3068_v53 }
 0x234   :  { %v3043_v19 = vpop.f32.mrf.mxu3 }
 0x238   :  { %v3082_v60 = vpop.f32.mrf.mxu1 }
 0x239   :  { %v3106_v30 = vpop.f32.mrf.mxu0 }
 0x23c   :  { %v3093_v31 = vpop.f32.mrf.mxu3 }
 0x23d   :  { %v3094_v51 = vadd.f32 %v3093_v31, %v3081_v57 }
 0x23e   :  { %v3119_v14 = vpop.f32.mrf.mxu2 }
 0x23f   :  { %v3107_v34 = vadd.f32 %v3106_v30, %v3094_v51 }
 0x240   :  { %v3132_v45 = vpop.f32.mrf.mxu1 }
 0x241   :  { %v3108_v54 = vpop.f32.mrf.mxu0  ;;  %v3120_v39 = vadd.f32 %v3119_v14, %v3107_v34 }
 0x243   :  { %v3133_v29 = vadd.f32 %v3132_v45, %v3120_v39 }
 0x244   :  { %v3095_v44 = vpop.f32.mrf.mxu3 }
 0x246   :  { %v3121_v15 = vpop.f32.mrf.mxu2 }
 0x248   :  { %v3134_v6 = vpop.f32.mrf.mxu1 }
 0x249   :  { %v3158_v40 = vpop.f32.mrf.mxu0 }
 0x24c   :  { %v3145_v12 = vpop.f32.mrf.mxu3 }
 0x24d   :  { %v3146_v43 = vadd.f32 %v3145_v12, %v3133_v29 }
 0x24e   :  { %v3171_v49 = vpop.f32.mrf.mxu2 }
 0x24f   :  { %v3159_v26 = vadd.f32 %v3158_v40, %v3146_v43 }
 0x251   :  { %v3172_v17 = vadd.f32 %v3171_v49, %v3159_v26  ;;  %v3160_v25 = vpop.f32.mrf.mxu0 }
 0x253   :  { %v3175_v35 = vmax.f32 %v3172_v17, 0.0 }
 0x254   :  { %v3147_v32 = vpop.f32.mrf.mxu3 }
 0x255   :  { %v3176_v7 = vpack.c.bf16 %v3175_v35, %v3175_v35 }
 0x256   :  { %v3173_v46 = vpop.f32.mrf.mxu2 }
 0x257   :  { %3253 = vmatmul.bf16.vlgmr.msra.gmra.mxu1 %v3176_v7 }
 0x2d4   :  { %v3254_v63 = vpop.f32.mrf.mxu1 }
 0x2d5   :  { %v3255_v48 = vadd.f32 %v4142_v33, %v3254_v63 }
 0x2d7   :  { %3258 = vmax.xlane.f32.xlu0 %v3255_v48 }
 0x2dc   :  { %v3256_v0 = vpop.f32.mrf.mxu1 }
 0x34a   :  { %v3259_v59 = vpop.xlane.xlu0 %3258 }
 0x34b   :  { %v3260_v5 = vsub.f32 %v3255_v48, %v3259_v59 }
 0x34d   :  { %v3261_v36 = vmul.f32 1.442695, %v3260_v5 }
 0x34f   :  { %4143 = vpow2.f32 %v3261_v36 }
 0x355   :  { %v4144_v47 = vpop.eup %4143 }
 0x356   :  { %3263 = vadd.xlane.f32.xlu0 %v4144_v47 }
 0x3c9   :  { %v3264_v38 = vpop.xlane.xlu0 %3263 }
 0x3ca   :  { %4145 = vlog2.f32 %v3264_v38 }
 0x3d0   :  { %v4146_v4 = vpop.eup %4145 }
 0x3d1   :  { %v3266_v11 = vmul.f32 0.6931472, %v4146_v4 }
 0x3d3   :  { %v3267_v56 = vadd.f32 %v3266_v11, %v3259_v59 }
 0x3d5   :  { %v3268_v1 = vsub.f32 %v3255_v48, %v3267_v56 }
 0x3d7   :  { %3269 = vst [vmem:[#allocation5] sm:$0xff] %v3268_v1 }
 0x3d8   :  { %3280 = dma.vmem_to_hbm [thread:$0]  %s3276_s20, 128, %s3278_s6, [#allocation4]  }
 0x3d9   :  { %4197 = dma.done.wait [#allocation4], 128  }
 0x3da   :  { %4198 = vsyncadd [#allocation4], 4294967168 }
 0x3db   :  { %3285 = vsyncpa [#allocation3], 1 }
 0x3dc   :  { %3286 = vsyncpa [#allocation4], 1 }

</bundles_post_ra>
